<compile_context>
chip_gen: v5e
topology: v5e:2x2
jax: 0.10.0
libtpu: 0.0.40
codegen_flags: <defaults>
</compile_context>

<pallas_src>
import functools
import math

import numpy as np
import jax
import jax.numpy as jnp
from jax import lax
from jax.experimental import pallas as pl
from jax.experimental.pallas import tpu as pltpu


def _round_up(a: int, b: int) -> int:
    return ((a + b - 1) // b) * b


def _make_aggregator_kernel(L: int, Lr: int, Tr: int, tk: int, tn: int,
                            ragged: bool):
    """Kernel for one (N-tile, L-tile) grid point. L/Lr/Tr/tk/tn static."""

    def kernel(x_ref, cnt_ref, o_ref):
        ki = pl.program_id(1)                 # L-reduction tile (innermost)
        nk = pl.num_programs(1)

        @pl.when(ki == 0)
        def _init():
            o_ref[...] = jnp.zeros_like(o_ref)

        # Adaptive-pool membership of flat index j in output column i:
        #   (j+1)*T > i*L  and  j*T < (i+1)*L
        # with (L, T) reduced by gcd -> (Lr, Tr) to keep products in int32.
        # Only ONE full-size (tk, tn) iota; iL is a (1, tn) row.
        jT = (lax.broadcasted_iota(jnp.int32, (tk, tn), 0) + ki * tk) * Tr
        iL = lax.broadcasted_iota(jnp.int32, (1, tn), 1) * Lr
        member = jnp.logical_and(jT + Tr > iL, jT < iL + Lr)
        m = member.astype(jnp.bfloat16)       # exact {0,1} weights in bf16

        x = x_ref[...]                        # (bn, tk) f32
        if ragged:
            # Last L-tile may read past L; block contents there are undefined
            # (0-weight alone is unsafe against garbage Inf/NaN) -> zero them.
            jx = lax.broadcasted_iota(jnp.int32, (1, tk), 1) + ki * tk
            x = jnp.where(jx < L, x, 0.0)

        # Split f32 x into 3 exact bf16 limbs; since m is exactly {0,1} in
        # bf16, three default-precision MXU passes reproduce f32-matmul
        # accuracy (f32 accumulation via preferred_element_type).
        x0 = x.astype(jnp.bfloat16)
        r1 = x - x0.astype(jnp.float32)
        x1 = r1.astype(jnp.bfloat16)
        x2 = (r1 - x1.astype(jnp.float32)).astype(jnp.bfloat16)
        contrib = jnp.dot(x0, m, preferred_element_type=jnp.float32)
        contrib = contrib + jnp.dot(x1, m, preferred_element_type=jnp.float32)
        contrib = contrib + jnp.dot(x2, m, preferred_element_type=jnp.float32)
        o_ref[...] += contrib

        @pl.when(ki == nk - 1)
        def _finalize():
            # Exact analytic window lengths, precomputed on the host.
            o_ref[...] = o_ref[...] / cnt_ref[...]

    return kernel


@functools.partial(jax.jit, static_argnums=1)
def aggregator_forward(features: jnp.ndarray, target_dim: int) -> jnp.ndarray:
    """Equivalent of Aggregator(target_dim)(features) for any >=2-D tensor."""
    N = features.shape[0]
    x = features.reshape(N, -1).astype(jnp.float32)     # (N, L) row-major flatten
    L = x.shape[1]
    T = int(target_dim)

    tn = T_pad = _round_up(T, 128)       # lane-dense, whole T resident per block
    bn = N if N <= 256 else 256          # N-tile (parallel axis; multiple of 8)

    g = math.gcd(L, T)
    Lr, Tr = L // g, T // g

    # Reduction tile: target ~>=1 MiB of x per grid step, bounded by a ~40 MiB
    # VMEM budget (double-buffered input + resident output + mask/limb temps)
    # so it is safe on v7x's 64 MiB as well as v5e/v6e's 128 MiB.
    vmem_budget = 40 * 1024 * 1024
    tk_vmem = (vmem_budget - 2 * bn * T_pad * 4) // (8 * bn + 16 * T_pad)
    tk_target = max(512, (1 << 20) // (4 * bn))
    tk = min(tk_target, tk_vmem, _round_up(L, 128), 8192)
    tk = max(128, (tk // 128) * 128)

    nk = pl.cdiv(L, tk)
    Lp = nk * tk
    ragged = (L % tk) != 0

    if (Lp + 1) * Tr >= 2 ** 31 or (T_pad + 1) * Lr >= 2 ** 31:
        # TODO(synk): wide-integer membership path for gigantic L*T products.
        raise ValueError("aggregator_forward: L*T too large for int32 mask math")

    # Exact per-column window lengths (depends only on static L, T); padded
    # lanes get a dummy value >= 1 so the finalize divide is always safe.
    idx = np.arange(T_pad, dtype=np.int64)
    cnt_np = np.maximum((((idx + 1) * L + T - 1) // T) - (idx * L) // T, 1)
    cnt = jnp.asarray(cnt_np.astype(np.float32).reshape(1, T_pad))

    grid = (pl.cdiv(N, bn), nk)          # (parallel N, arbitrary L-reduction)

    out = pl.pallas_call(
        _make_aggregator_kernel(L, Lr, Tr, tk, tn, ragged),
        out_shape=jax.ShapeDtypeStruct((N, T_pad), jnp.float32),
        grid_spec=pltpu.PrefetchScalarGridSpec(
            num_scalar_prefetch=0,
            grid=grid,
            in_specs=[
                pl.BlockSpec((bn, tk), lambda ni, ki: (ni, ki)),   # x, read once
                pl.BlockSpec((1, tn), lambda ni, ki: (0, 0)),      # window sizes
            ],
            out_specs=pl.BlockSpec((bn, tn), lambda ni, ki: (ni, 0)),
        ),
        compiler_params=pltpu.CompilerParams(
            dimension_semantics=("parallel", "arbitrary"),
            vmem_limit_bytes=48 * 1024 * 1024,
        ),
        cost_estimate=pl.CostEstimate(
            flops=2 * 3 * N * Lp * T_pad,
            transcendentals=0,
            bytes_accessed=N * L * 4 + N * T_pad * 4 + T_pad * 4,
        ),
    )(x, cnt)
    return out[:, :T]                    # drop lane padding -> (N, T)


def _reference(features: np.ndarray, target_dim: int) -> np.ndarray:
    """Pure NumPy reference of the PyTorch forward (adaptive_avg_pool1d)."""
    N = features.shape[0]
    x = features.reshape(N, -1).astype(np.float64)
    L = x.shape[1]
    out = np.zeros((N, target_dim), dtype=np.float64)
    for i in range(target_dim):
        s = (i * L) // target_dim
        e = -((-(i + 1) * L) // target_dim)
        out[:, i] = x[:, s:e].mean(axis=1)
    return out.astype(np.float32)


if __name__ == "__main__":
    key = jax.random.PRNGKey(0)
    # Small NCHW feature map: flattened length L = 4*16*16 = 1024.
    N, C, H, W = 2, 4, 16, 16
    features = jax.random.normal(key, (N, C, H, W), dtype=jnp.float32)

    # 96: non-divisor of L, single lane tile (96 -> 128 lane padding).
    # 160: non-divisor, T_pad = 256 (wider resident output block).
    for target_dim in (96, 160):
        out = jax.block_until_ready(aggregator_forward(features, target_dim))
        ref = _reference(np.asarray(features), target_dim)
        assert out.shape == (N, target_dim)
        np.testing.assert_allclose(np.asarray(out), ref, rtol=1e-5, atol=1e-5)

    print("KERNEL_OK")
</pallas_src>

<mosaic_0001>
module attributes {stable_mosaic.version = 11 : i64} {
  func.func @kernel(%arg0: i32, %arg1: i32, %arg2: memref<2x1024xf32, #tpu.memory_space<vmem>>, %arg3: memref<1x128xf32, #tpu.memory_space<vmem>>, %arg4: memref<2x128xf32, #tpu.memory_space<vmem>>) attributes {dimension_semantics = [#tpu.dimension_semantics<parallel>, #tpu.dimension_semantics<arbitrary>], iteration_bounds = array<i64: 1, 1>, scalar_prefetch = 0 : i64, scratch_operands = 0 : i64, tpu.core_type = #tpu.core_type<tc>, window_params = [{transform_indices = @transform_0, window_bounds = array<i64: 2, 1024>}, {pipeline_mode = #tpu.pipeline_mode<synchronous>, transform_indices = @transform_1, window_bounds = array<i64: 1, 128>}, {transform_indices = @transform_2, window_bounds = array<i64: 2, 128>}]} {
    %c0_i32 = arith.constant 0 : i32
    %0 = arith.cmpi eq, %arg1, %c0_i32 : i32
    %1 = arith.extui %0 : i1 to i32
    %c0_i32_0 = arith.constant 0 : i32
    %2 = arith.cmpi ne, %1, %c0_i32_0 : i32
    scf.if %2 {
      %cst_12 = arith.constant 0.000000e+00 : f32
      %43 = vector.broadcast %cst_12 : f32 to vector<2x128xf32>
      %c0_13 = arith.constant 0 : index
      %c0_14 = arith.constant 0 : index
      %44 = vector.load %arg4[%c0_13, %c0_14] : memref<2x128xf32, #tpu.memory_space<vmem>>, vector<2x128xf32>
      tpu.vector_store %arg4[%c0_13, %c0_14], %43 {strides = array<i32>} : memref<2x128xf32, #tpu.memory_space<vmem>>, vector<2x128xf32>,
    } else {
    }
    %3 = tpu.iota {dimensions = array<i32: 0>} : vector<1024x128xi32>
    %c1024_i32 = arith.constant 1024 : i32
    %4 = arith.muli %arg1, %c1024_i32 : i32
    %5 = vector.broadcast %4 : i32 to vector<1024x128xi32>
    %6 = arith.addi %3, %5 : vector<1024x128xi32>
    %c3_i32 = arith.constant 3 : i32
    %7 = vector.broadcast %c3_i32 : i32 to vector<1024x128xi32>
    %8 = arith.muli %6, %7 : vector<1024x128xi32>
    %9 = tpu.iota {dimensions = array<i32: 1>} : vector<1x128xi32>
    %c32_i32 = arith.constant 32 : i32
    %10 = vector.broadcast %c32_i32 : i32 to vector<1x128xi32>
    %11 = arith.muli %9, %10 : vector<1x128xi32>
    %c3_i32_1 = arith.constant 3 : i32
    %12 = vector.broadcast %c3_i32_1 : i32 to vector<1024x128xi32>
    %13 = arith.addi %8, %12 : vector<1024x128xi32>
    %14 = vector.broadcast %11 : vector<1x128xi32> to vector<1024x128xi32>
    %15 = arith.cmpi sgt, %13, %14 : vector<1024x128xi32>
    %c32_i32_2 = arith.constant 32 : i32
    %16 = vector.broadcast %c32_i32_2 : i32 to vector<1x128xi32>
    %17 = arith.addi %11, %16 : vector<1x128xi32>
    %18 = vector.broadcast %17 : vector<1x128xi32> to vector<1024x128xi32>
    %19 = arith.cmpi slt, %8, %18 : vector<1024x128xi32>
    %20 = arith.andi %15, %19 : vector<1024x128xi1>
    %21 = arith.extui %20 : vector<1024x128xi1> to vector<1024x128xi32>
    %22 = arith.sitofp %21 : vector<1024x128xi32> to vector<1024x128xf32>
    %23 = arith.truncf %22 : vector<1024x128xf32> to vector<1024x128xbf16>
    %c0 = arith.constant 0 : index
    %c0_3 = arith.constant 0 : index
    %24 = vector.load %arg2[%c0, %c0_3] : memref<2x1024xf32, #tpu.memory_space<vmem>>, vector<2x1024xf32>
    %25 = arith.truncf %24 : vector<2x1024xf32> to vector<2x1024xbf16>
    %26 = arith.extf %25 : vector<2x1024xbf16> to vector<2x1024xf32>
    %27 = arith.subf %24, %26 : vector<2x1024xf32>
    %28 = arith.truncf %27 : vector<2x1024xf32> to vector<2x1024xbf16>
    %29 = arith.extf %28 : vector<2x1024xbf16> to vector<2x1024xf32>
    %30 = arith.subf %27, %29 : vector<2x1024xf32>
    %31 = arith.truncf %30 : vector<2x1024xf32> to vector<2x1024xbf16>
    %cst = arith.constant dense<0.000000e+00> : vector<2x128xf32>
    %32 = tpu.matmul %25, %23, %cst {dimension_numbers = #tpu.dot_dimension_numbers<[1], [0], [0], [1], [0, 0, 1, 1], [], []>} : vector<2x1024xbf16>, vector<1024x128xbf16>, vector<2x128xf32> -> vector<2x128xf32>
    %cst_4 = arith.constant dense<0.000000e+00> : vector<2x128xf32>
    %33 = tpu.matmul %28, %23, %cst_4 {dimension_numbers = #tpu.dot_dimension_numbers<[1], [0], [0], [1], [0, 0, 1, 1], [], []>} : vector<2x1024xbf16>, vector<1024x128xbf16>, vector<2x128xf32> -> vector<2x128xf32>
    %34 = arith.addf %32, %33 : vector<2x128xf32>
    %cst_5 = arith.constant dense<0.000000e+00> : vector<2x128xf32>
    %35 = tpu.matmul %31, %23, %cst_5 {dimension_numbers = #tpu.dot_dimension_numbers<[1], [0], [0], [1], [0, 0, 1, 1], [], []>} : vector<2x1024xbf16>, vector<1024x128xbf16>, vector<2x128xf32> -> vector<2x128xf32>
    %36 = arith.addf %34, %35 : vector<2x128xf32>
    %c0_6 = arith.constant 0 : index
    %c0_7 = arith.constant 0 : index
    %37 = vector.load %arg4[%c0_6, %c0_7] : memref<2x128xf32, #tpu.memory_space<vmem>>, vector<2x128xf32>
    %38 = arith.addf %37, %36 : vector<2x128xf32>
    %c0_8 = arith.constant 0 : index
    %c0_9 = arith.constant 0 : index
    %39 = vector.load %arg4[%c0_8, %c0_9] : memref<2x128xf32, #tpu.memory_space<vmem>>, vector<2x128xf32>
    tpu.vector_store %arg4[%c0_8, %c0_9], %38 {strides = array<i32>} : memref<2x128xf32, #tpu.memory_space<vmem>>, vector<2x128xf32>,
    %c0_i32_10 = arith.constant 0 : i32
    %40 = arith.cmpi eq, %arg1, %c0_i32_10 : i32
    %41 = arith.extui %40 : i1 to i32
    %c0_i32_11 = arith.constant 0 : i32
    %42 = arith.cmpi ne, %41, %c0_i32_11 : i32
    scf.if %42 {
      %c0_12 = arith.constant 0 : index
      %c0_13 = arith.constant 0 : index
      %43 = vector.load %arg4[%c0_12, %c0_13] : memref<2x128xf32, #tpu.memory_space<vmem>>, vector<2x128xf32>
      %c0_14 = arith.constant 0 : index
      %c0_15 = arith.constant 0 : index
      %44 = vector.load %arg3[%c0_14, %c0_15] : memref<1x128xf32, #tpu.memory_space<vmem>>, vector<1x128xf32>
      %45 = vector.broadcast %44 : vector<1x128xf32> to vector<2x128xf32>
      %46 = arith.divf %43, %45 : vector<2x128xf32>
      %c0_16 = arith.constant 0 : index
      %c0_17 = arith.constant 0 : index
      %47 = vector.load %arg4[%c0_16, %c0_17] : memref<2x128xf32, #tpu.memory_space<vmem>>, vector<2x128xf32>
      tpu.vector_store %arg4[%c0_16, %c0_17], %46 {strides = array<i32>} : memref<2x128xf32, #tpu.memory_space<vmem>>, vector<2x128xf32>,
    } else {
    }
    return
  }
  func.func @transform_0(%arg0: i32, %arg1: i32) -> (i32, i32) {
    %c0_i32 = arith.constant 0 : i32
    return %arg0, %arg1 : i32, i32
  }
  func.func @transform_1(%arg0: i32, %arg1: i32) -> (i32, i32) {
    %c0_i32 = arith.constant 0 : i32
    %c0_i32_0 = arith.constant 0 : i32
    %c0_i32_1 = arith.constant 0 : i32
    return %c0_i32, %c0_i32_0 : i32, i32
  }
  func.func @transform_2(%arg0: i32, %arg1: i32) -> (i32, i32) {
    %c0_i32 = arith.constant 0 : i32
    %c0_i32_0 = arith.constant 0 : i32
    return %arg0, %c0_i32 : i32, i32
  }
}

</mosaic_0001>

<bundles_post_ra>
// kernel: aggregator_forward.1
= control target key start
LH: loop header
LB: loop body
LE: loop exit
PB: predicated region body
PF: predicated region fallthrough
CT: control target
= control target key end

     0   :  { %v17_v0 = vlaneseq  ;;  %s4337_s0 = inlined_call_operand.vmem [shape: f32[2,1024], index: 0, kind: input, shape index: {}]   ;;  %s4338_s1 = inlined_call_operand.vmem [shape: f32[1,128], index: 1, kind: input, shape index: {}]   ;;  %s4339_s2 = inlined_call_operand.hbm [shape: f32[2,128], index: 2, kind: output, shape index: {}]  }
   0x1   :  { %7 = vsyncpa [#allocation3], 0  ;;  %v4534_v30 = vmov 0  ;;  %v4404_v35 = vmov 1.0|1.0   ;;  %v4538_v42 = vmov 0 }
   0x2   :  { %v2362_v1 = vshrl.u32 %v17_v0, 7  ;;  %v405_v2 = vand.u32 127, %v17_v0  ;;  %v4540_v48 = vmov 0  ;;  %v4544_v57 = vmov 0  ;;  %s1791_s17 = sshll.u32 %s4339_s2, 4  ;;  %s1792_s17 = int_to_ptr.hbm [resolvable:$true] %s1791_s17 }
   0x3   :  { %v4554_v27 = vmov 0  ;;  %v4556_v36 = vmov 0 }
   0x4   :  { %v32_v3 = vadd.s32 112, %v2362_v1  ;;  %v33_v4 = vadd.s32 120, %v2362_v1  ;;  %v2366_v5 = vmul.u32 32, %v405_v2  ;;  %v48_v6 = vadd.s32 240, %v2362_v1 }
   0x5   :  { %v49_v7 = vadd.s32 248, %v2362_v1  ;;  %v64_v8 = vadd.s32 368, %v2362_v1  ;;  %v65_v9 = vadd.s32 376, %v2362_v1  ;;  %v80_v17 = vadd.s32 496, %v2362_v1 }
   0x6   :  { %v290_v10 = vmul.u32 3, %v32_v3  ;;  %v291_v11 = vmul.u32 3, %v33_v4  ;;  %v2373_v12 = vadd.s32 32, %v2366_v5  ;;  %v306_v13 = vmul.u32 3, %v48_v6 }
   0x7   :  { %v307_v14 = vmul.u32 3, %v49_v7  ;;  %v322_v15 = vmul.u32 3, %v64_v8  ;;  %v323_v16 = vmul.u32 3, %v65_v9  ;;  %v81_v20 = vadd.s32 504, %v2362_v1 }
   0x8   :  { %v421_v18 = vadd.s32 3, %v290_v10  ;;  %v422_v19 = vadd.s32 3, %v291_v11  ;;  %vm678_vm0 = vcmp.lt.s32.totalorder %v290_v10, %v2373_v12  ;;  %vm679_vm1 = vcmp.lt.s32.totalorder %v291_v11, %v2373_v12 }
   0x9   :  { %v437_v21 = vadd.s32 3, %v306_v13  ;;  %v438_v22 = vadd.s32 3, %v307_v14  ;;  %v453_v23 = vadd.s32 3, %v322_v15  ;;  %vm2383_vm6 = vcmp.lt.s32.totalorder %v306_v13, %v2373_v12 }
   0xa   :  { %vm549_vm2 = vcmp.gt.s32.totalorder %v421_v18, %v2366_v5  ;;  %vm550_vm3 = vcmp.gt.s32.totalorder %v422_v19, %v2366_v5  ;;  %vm2388_vm7 = vcmp.lt.s32.totalorder %v307_v14, %v2373_v12  ;;  %v454_v26 = vadd.s32 3, %v323_v16 }
   0xb   :  { %vm806_vm4 = vmand %vm549_vm2, %vm678_vm0  ;;  %vm565_vm5 = vcmp.gt.s32.totalorder %v437_v21, %v2366_v5  ;;  %vm566_vm9 = vcmp.gt.s32.totalorder %v438_v22, %v2366_v5  ;;  %vm2394_vm10 = vcmp.lt.s32.totalorder %v322_v15, %v2373_v12  ;;  %v338_v28 = vmul.u32 3, %v80_v17 }
   0xc   :  { %vm807_vm8 = vmand %vm550_vm3, %vm679_vm1  ;;  %v339_v29 = vmul.u32 3, %v81_v20  ;;  %v30_v31 = vadd.s32 96, %v2362_v1  ;;  %v31_v32 = vadd.s32 104, %v2362_v1  ;;  %v46_v33 = vadd.s32 224, %v2362_v1 }
   0xd   :  { %vm2398_vm11 = vmpackc.low %vm807_vm8, %vm806_vm4  ;;  %v47_v34 = vadd.s32 232, %v2362_v1  ;;  %vm581_vm13 = vcmp.gt.s32.totalorder %v453_v23, %v2366_v5  ;;  %vm2415_vm14 = vcmp.lt.s32.totalorder %v323_v16, %v2373_v12  ;;  %v469_v37 = vadd.s32 3, %v338_v28 }
   0xe   :  { %v4535_v30 = vsel %vm2398_vm11, 4294967295, %v4534_v30  ;;  %1929 = vmatpush.bf16.msk.msra.mxu0 %vm2398_vm11, %v4404_v35  ;;  %vm822_vm12 = vmand %vm565_vm5, %vm2383_vm6  ;;  %v470_v38 = vadd.s32 3, %v339_v29  ;;  %vm582_vm0 = vcmp.gt.s32.totalorder %v454_v26, %v2366_v5  ;;  %v288_v39 = vmul.u32 3, %v30_v31 }
   0xf   :  { %vm823_vm15 = vmand %vm566_vm9, %vm2388_vm7  ;;  %v289_v40 = vmul.u32 3, %v31_v32  ;;  %v304_v41 = vmul.u32 3, %v46_v33  ;;  %v305_v43 = vmul.u32 3, %v47_v34  ;;  %v62_v44 = vadd.s32 352, %v2362_v1 }
  0x10   :  { %vm2424_vm1 = vmpackc.low %vm823_vm15, %vm822_vm12  ;;  %v63_v45 = vadd.s32 360, %v2362_v1  ;;  %vm597_vm3 = vcmp.gt.s32.totalorder %v469_v37, %v2366_v5  ;;  %vm726_vm4 = vcmp.lt.s32.totalorder %v338_v28, %v2373_v12  ;;  %v419_v46 = vadd.s32 3, %v288_v39 }
  0x11   :  { %v4539_v42 = vsel %vm2424_vm1, 4294967295, %v4538_v42  ;;  %1945 = vmatpush.bf16.msk.msra.mxu1 %vm2424_vm1, %v4404_v35  ;;  %vm838_vm2 = vmand %vm581_vm13, %vm2394_vm10  ;;  %v420_v47 = vadd.s32 3, %v289_v40  ;;  %vm598_vm6 = vcmp.gt.s32.totalorder %v470_v38, %v2366_v5  ;;  %vm727_vm7 = vcmp.lt.s32.totalorder %v339_v29, %v2373_v12 }
  0x12   :  { %vm839_vm5 = vmand %vm582_vm0, %vm2415_vm14  ;;  %vm2446_vm9 = vcmp.lt.s32.totalorder %v288_v39, %v2373_v12  ;;  %v435_v50 = vadd.s32 3, %v304_v41  ;;  %v320_v51 = vmul.u32 3, %v62_v44  ;;  %v321_v52 = vmul.u32 3, %v63_v45 }
  0x13   :  { %vm2441_vm8 = vmpackc.low %vm839_vm5, %vm838_vm2  ;;  %vm547_vm12 = vcmp.gt.s32.totalorder %v419_v46, %v2366_v5  ;;  %v436_v53 = vadd.s32 3, %v305_v43  ;;  %v78_v54 = vadd.s32 480, %v2362_v1  ;;  %v79_v55 = vadd.s32 488, %v2362_v1 }
  0x14   :  { %v4541_v48 = vsel %vm2441_vm8, 4294967295, %v4540_v48  ;;  %1961 = vmatpush.bf16.msk.msra.mxu2 %vm2441_vm8, %v4404_v35  ;;  %vm854_vm10 = vmand %vm597_vm3, %vm726_vm4  ;;  %vm548_vm14 = vcmp.gt.s32.totalorder %v420_v47, %v2366_v5  ;;  %vm677_vm15 = vcmp.lt.s32.totalorder %v289_v40, %v2373_v12  ;;  %v451_v56 = vadd.s32 3, %v320_v51 }
  0x15   :  { %vm855_vm13 = vmand %vm598_vm6, %vm727_vm7  ;;  %v336_v58 = vmul.u32 3, %v78_v54  ;;  %v337_v59 = vmul.u32 3, %v79_v55  ;;  %v28_v60 = vadd.s32 80, %v2362_v1  ;;  %v29_v61 = vadd.s32 88, %v2362_v1 }
  0x16   :  { %vm2458_vm0 = vmpackc.low %vm855_vm13, %vm854_vm10  ;;  %vm563_vm3 = vcmp.gt.s32.totalorder %v435_v50, %v2366_v5  ;;  %vm692_vm4 = vcmp.lt.s32.totalorder %v304_v41, %v2373_v12  ;;  %v452_v62 = vadd.s32 3, %v321_v52  ;;  %v44_v63 = vadd.s32 208, %v2362_v1 }
  0x17   :  { %v4545_v57 = vsel %vm2458_vm0, 4294967295, %v4544_v57  ;;  %1977 = vmatpush.bf16.msk.msra.mxu3 %vm2458_vm0, %v4404_v35  ;;  %vm804_vm2 = vmand %vm547_vm12, %vm2446_vm9  ;;  %vm564_vm6 = vcmp.gt.s32.totalorder %v436_v53, %v2366_v5  ;;  %vm693_vm7 = vcmp.lt.s32.totalorder %v305_v43, %v2373_v12  ;;  %v45_v0 = vadd.s32 216, %v2362_v1 }
  0x18   :  { %vm805_vm5 = vmand %vm548_vm14, %vm677_vm15  ;;  %v4546_v2 = vmov 0  ;;  %v467_v3 = vadd.s32 3, %v336_v58  ;;  %v286_v4 = vmul.u32 3, %v28_v60  ;;  %v287_v6 = vmul.u32 3, %v29_v61 }
  0x19   :  { %vm2475_vm10 = vmpackc.low %vm805_vm5, %vm804_vm2  ;;  %vm579_vm12 = vcmp.gt.s32.totalorder %v451_v56, %v2366_v5  ;;  %vm708_vm13 = vcmp.lt.s32.totalorder %v320_v51, %v2373_v12  ;;  %v468_v7 = vadd.s32 3, %v337_v59  ;;  %v60_v8 = vadd.s32 336, %v2362_v1 }
  0x1a   :  { %v4547_v2 = vsel %vm2475_vm10, 4294967295, %v4546_v2  ;;  %1931 = vmatpush.bf16.msk.msra.mxu0 %vm2475_vm10, %v4404_v35  ;;  %vm820_vm9 = vmand %vm563_vm3, %vm692_vm4  ;;  %vm580_vm15 = vcmp.gt.s32.totalorder %v452_v62, %v2366_v5  ;;  %vm709_vm2 = vcmp.lt.s32.totalorder %v321_v52, %v2373_v12  ;;  %v302_v9 = vmul.u32 3, %v44_v63 }
  0x1b   :  { %vm821_vm14 = vmand %vm564_vm6, %vm693_vm7  ;;  %v61_v10 = vadd.s32 344, %v2362_v1  ;;  %v4548_v11 = vmov 0  ;;  %v417_v13 = vadd.s32 3, %v286_v4  ;;  %v303_v14 = vmul.u32 3, %v45_v0 }
  0x1c   :  { %vm2488_vm5 = vmpackc.low %vm821_vm14, %vm820_vm9  ;;  %vm595_vm4 = vcmp.gt.s32.totalorder %v467_v3, %v2366_v5  ;;  %vm724_vm6 = vcmp.lt.s32.totalorder %v336_v58, %v2373_v12  ;;  %vm2498_vm7 = vcmp.lt.s32.totalorder %v337_v59, %v2373_v12  ;;  %v418_v16 = vadd.s32 3, %v287_v6 }
  0x1d   :  { %v4549_v11 = vsel %vm2488_vm5, 4294967295, %v4548_v11  ;;  %1947 = vmatpush.bf16.msk.msra.mxu1 %vm2488_vm5, %v4404_v35  ;;  %vm836_vm3 = vmand %vm579_vm12, %vm708_vm13  ;;  %vm596_vm14 = vcmp.gt.s32.totalorder %v468_v7, %v2366_v5  ;;  %v318_v17 = vmul.u32 3, %v60_v8  ;;  %v76_v18 = vadd.s32 464, %v2362_v1 }
  0x1e   :  { %vm837_vm9 = vmand %vm580_vm15, %vm709_vm2  ;;  %v77_v19 = vadd.s32 472, %v2362_v1  ;;  %v4552_v20 = vmov 0  ;;  %v433_v21 = vadd.s32 3, %v302_v9  ;;  %v319_v22 = vmul.u32 3, %v61_v10 }
  0x1f   :  { %vm2505_vm0 = vmpackc.low %vm837_vm9, %vm836_vm3  ;;  %vm545_vm13 = vcmp.gt.s32.totalorder %v417_v13, %v2366_v5  ;;  %vm674_vm15 = vcmp.lt.s32.totalorder %v286_v4, %v2373_v12  ;;  %v434_v23 = vadd.s32 3, %v303_v14  ;;  %v26_v24 = vadd.s32 64, %v2362_v1 }
  0x20   :  { %v4553_v20 = vsel %vm2505_vm0, 4294967295, %v4552_v20  ;;  %1963 = vmatpush.bf16.msk.msra.mxu2 %vm2505_vm0, %v4404_v35  ;;  %vm852_vm12 = vmand %vm595_vm4, %vm724_vm6  ;;  %vm546_vm3 = vcmp.gt.s32.totalorder %v418_v16, %v2366_v5  ;;  %vm675_vm9 = vcmp.lt.s32.totalorder %v287_v6, %v2373_v12  ;;  %v334_v25 = vmul.u32 3, %v76_v18 }
  0x21   :  { %vm853_vm2 = vmand %vm596_vm14, %vm2498_vm7  ;;  %v27_v26 = vadd.s32 72, %v2362_v1  ;;  %v449_v28 = vadd.s32 3, %v318_v17  ;;  %v335_v29 = vmul.u32 3, %v77_v19  ;;  %vm561_vm6 = vcmp.gt.s32.totalorder %v433_v21, %v2366_v5 }
  0x22   :  { %vm2520_vm5 = vmpackc.low %vm853_vm2, %vm852_vm12  ;;  %vm690_vm7 = vcmp.lt.s32.totalorder %v302_v9, %v2373_v12  ;;  %v450_v31 = vadd.s32 3, %v319_v22  ;;  %v42_v32 = vadd.s32 192, %v2362_v1  ;;  %vm562_vm12 = vcmp.gt.s32.totalorder %v434_v23, %v2366_v5 }
  0x23   :  { %v4555_v27 = vsel %vm2520_vm5, 4294967295, %v4554_v27  ;;  %1979 = vmatpush.bf16.msk.msra.mxu3 %vm2520_vm5, %v4404_v35  ;;  %vm802_vm4 = vmand %vm545_vm13, %vm674_vm15  ;;  %vm691_vm2 = vcmp.lt.s32.totalorder %v303_v14, %v2373_v12  ;;  %v284_v33 = vmul.u32 3, %v26_v24  ;;  %v43_v34 = vadd.s32 200, %v2362_v1 }
  0x24   :  { %vm803_vm14 = vmand %vm546_vm3, %vm675_vm9  ;;  %v465_v37 = vadd.s32 3, %v334_v25  ;;  %v285_v38 = vmul.u32 3, %v27_v26  ;;  %vm577_vm15 = vcmp.gt.s32.totalorder %v449_v28, %v2366_v5  ;;  %vm706_vm3 = vcmp.lt.s32.totalorder %v318_v17, %v2373_v12 }
  0x25   :  { %vm2533_vm0 = vmpackc.low %vm803_vm14, %vm802_vm4  ;;  %v466_v39 = vadd.s32 3, %v335_v29  ;;  %v58_v40 = vadd.s32 320, %v2362_v1  ;;  %vm578_vm4 = vcmp.gt.s32.totalorder %v450_v31, %v2366_v5  ;;  %vm707_vm14 = vcmp.lt.s32.totalorder %v319_v22, %v2373_v12 }
  0x26   :  { %v4557_v36 = vsel %vm2533_vm0, 4294967295, %v4556_v36  ;;  %1933 = vmatpush.bf16.msk.msra.mxu0 %vm2533_vm0, %v4404_v35  ;;  %vm818_vm13 = vmand %vm561_vm6, %vm690_vm7  ;;  %v300_v41 = vmul.u32 3, %v42_v32  ;;  %v59_v43 = vadd.s32 328, %v2362_v1  ;;  %v4558_v44 = vmov 0 }
  0x27   :  { %vm819_vm9 = vmand %vm562_vm12, %vm691_vm2  ;;  %v415_v45 = vadd.s32 3, %v284_v33  ;;  %v301_v46 = vmul.u32 3, %v43_v34  ;;  %vm593_vm7 = vcmp.gt.s32.totalorder %v465_v37, %v2366_v5  ;;  %vm722_vm12 = vcmp.lt.s32.totalorder %v334_v25, %v2373_v12 }
  0x28   :  { %vm2546_vm5 = vmpackc.low %vm819_vm9, %vm818_vm13  ;;  %v416_v47 = vadd.s32 3, %v285_v38  ;;  %v74_v49 = vadd.s32 448, %v2362_v1  ;;  %vm594_vm13 = vcmp.gt.s32.totalorder %v466_v39, %v2366_v5  ;;  %vm723_vm9 = vcmp.lt.s32.totalorder %v335_v29, %v2373_v12 }
  0x29   :  { %v4559_v44 = vsel %vm2546_vm5, 4294967295, %v4558_v44  ;;  %1949 = vmatpush.bf16.msk.msra.mxu1 %vm2546_vm5, %v4404_v35  ;;  %vm834_vm6 = vmand %vm577_vm15, %vm706_vm3  ;;  %v316_v50 = vmul.u32 3, %v58_v40  ;;  %v75_v51 = vadd.s32 456, %v2362_v1  ;;  %v4560_v52 = vmov 0 }
  0x2a   :  { %vm835_vm2 = vmand %vm578_vm4, %vm707_vm14  ;;  %v431_v53 = vadd.s32 3, %v300_v41  ;;  %v317_v54 = vmul.u32 3, %v59_v43  ;;  %vm543_vm3 = vcmp.gt.s32.totalorder %v415_v45, %v2366_v5  ;;  %vm672_vm4 = vcmp.lt.s32.totalorder %v284_v33, %v2373_v12 }
  0x2b   :  { %vm2559_vm0 = vmpackc.low %vm835_vm2, %vm834_vm6  ;;  %v432_v55 = vadd.s32 3, %v301_v46  ;;  %v24_v56 = vadd.s32 48, %v2362_v1  ;;  %vm544_vm6 = vcmp.gt.s32.totalorder %v416_v47, %v2366_v5  ;;  %vm673_vm2 = vcmp.lt.s32.totalorder %v285_v38, %v2373_v12 }
  0x2c   :  { %v4561_v52 = vsel %vm2559_vm0, 4294967295, %v4560_v52  ;;  %1965 = vmatpush.bf16.msk.msra.mxu2 %vm2559_vm0, %v4404_v35  ;;  %vm850_vm15 = vmand %vm593_vm7, %vm722_vm12  ;;  %v332_v58 = vmul.u32 3, %v74_v49  ;;  %v25_v59 = vadd.s32 56, %v2362_v1  ;;  %v4562_v60 = vmov 0 }
  0x2d   :  { %vm851_vm14 = vmand %vm594_vm13, %vm723_vm9  ;;  %v447_v61 = vadd.s32 3, %v316_v50  ;;  %v333_v62 = vmul.u32 3, %v75_v51  ;;  %vm559_vm12 = vcmp.gt.s32.totalorder %v431_v53, %v2366_v5  ;;  %vm688_vm13 = vcmp.lt.s32.totalorder %v300_v41, %v2373_v12 }
  0x2e   :  { %vm2572_vm5 = vmpackc.low %vm851_vm14, %vm850_vm15  ;;  %v448_v63 = vadd.s32 3, %v317_v54  ;;  %v40_v0 = vadd.s32 176, %v2362_v1  ;;  %vm560_vm15 = vcmp.gt.s32.totalorder %v432_v55, %v2366_v5  ;;  %vm689_vm14 = vcmp.lt.s32.totalorder %v301_v46, %v2373_v12 }
  0x2f   :  { %v4563_v60 = vsel %vm2572_vm5, 4294967295, %v4562_v60  ;;  %1981 = vmatpush.bf16.msk.msra.mxu3 %vm2572_vm5, %v4404_v35  ;;  %vm800_vm7 = vmand %vm543_vm3, %vm672_vm4  ;;  %v282_v3 = vmul.u32 3, %v24_v56  ;;  %v41_v4 = vadd.s32 184, %v2362_v1  ;;  %v4564_v6 = vmov 0 }
  0x30   :  { %vm801_vm9 = vmand %vm544_vm6, %vm673_vm2  ;;  %v463_v7 = vadd.s32 3, %v332_v58  ;;  %v283_v8 = vmul.u32 3, %v25_v59  ;;  %vm575_vm4 = vcmp.gt.s32.totalorder %v447_v61, %v2366_v5  ;;  %vm704_vm6 = vcmp.lt.s32.totalorder %v316_v50, %v2373_v12 }
  0x31   :  { %vm2585_vm0 = vmpackc.low %vm801_vm9, %vm800_vm7  ;;  %v464_v9 = vadd.s32 3, %v333_v62  ;;  %v56_v10 = vadd.s32 304, %v2362_v1  ;;  %vm576_vm7 = vcmp.gt.s32.totalorder %v448_v63, %v2366_v5  ;;  %vm705_vm9 = vcmp.lt.s32.totalorder %v317_v54, %v2373_v12 }
  0x32   :  { %v4565_v6 = vsel %vm2585_vm0, 4294967295, %v4564_v6  ;;  %1935 = vmatpush.bf16.msk.msra.mxu0 %vm2585_vm0, %v4404_v35  ;;  %vm816_vm3 = vmand %vm559_vm12, %vm688_vm13  ;;  %v298_v13 = vmul.u32 3, %v40_v0  ;;  %v57_v14 = vadd.s32 312, %v2362_v1  ;;  %v4566_v15 = vmov 0 }
  0x33   :  { %vm817_vm2 = vmand %vm560_vm15, %vm689_vm14  ;;  %v413_v16 = vadd.s32 3, %v282_v3  ;;  %v299_v17 = vmul.u32 3, %v41_v4  ;;  %vm591_vm13 = vcmp.gt.s32.totalorder %v463_v7, %v2366_v5  ;;  %vm720_vm15 = vcmp.lt.s32.totalorder %v332_v58, %v2373_v12 }
  0x34   :  { %vm2598_vm5 = vmpackc.low %vm817_vm2, %vm816_vm3  ;;  %v414_v18 = vadd.s32 3, %v283_v8  ;;  %v72_v19 = vadd.s32 432, %v2362_v1  ;;  %vm592_vm3 = vcmp.gt.s32.totalorder %v464_v9, %v2366_v5  ;;  %vm721_vm2 = vcmp.lt.s32.totalorder %v333_v62, %v2373_v12 }
  0x35   :  { %v4567_v15 = vsel %vm2598_vm5, 4294967295, %v4566_v15  ;;  %1951 = vmatpush.bf16.msk.msra.mxu1 %vm2598_vm5, %v4404_v35  ;;  %vm832_vm12 = vmand %vm575_vm4, %vm704_vm6  ;;  %v314_v21 = vmul.u32 3, %v56_v10  ;;  %v73_v22 = vadd.s32 440, %v2362_v1  ;;  %v4568_v23 = vmov 0 }
  0x36   :  { %vm833_vm14 = vmand %vm576_vm7, %vm705_vm9  ;;  %v429_v24 = vadd.s32 3, %v298_v13  ;;  %v315_v25 = vmul.u32 3, %v57_v14  ;;  %vm541_vm6 = vcmp.gt.s32.totalorder %v413_v16, %v2366_v5  ;;  %vm670_vm7 = vcmp.lt.s32.totalorder %v282_v3, %v2373_v12 }
  0x37   :  { %vm2611_vm0 = vmpackc.low %vm833_vm14, %vm832_vm12  ;;  %v430_v26 = vadd.s32 3, %v299_v17  ;;  %v22_v28 = vadd.s32 32, %v2362_v1  ;;  %vm542_vm12 = vcmp.gt.s32.totalorder %v414_v18, %v2366_v5  ;;  %vm671_vm14 = vcmp.lt.s32.totalorder %v283_v8, %v2373_v12 }
  0x38   :  { %v4569_v23 = vsel %vm2611_vm0, 4294967295, %v4568_v23  ;;  %1967 = vmatpush.bf16.msk.msra.mxu2 %vm2611_vm0, %v4404_v35  ;;  %vm848_vm4 = vmand %vm591_vm13, %vm720_vm15  ;;  %v330_v29 = vmul.u32 3, %v72_v19  ;;  %v23_v31 = vadd.s32 40, %v2362_v1  ;;  %v4570_v32 = vmov 0 }
  0x39   :  { %vm849_vm9 = vmand %vm592_vm3, %vm721_vm2  ;;  %v445_v33 = vadd.s32 3, %v314_v21  ;;  %v331_v34 = vmul.u32 3, %v73_v22  ;;  %vm557_vm15 = vcmp.gt.s32.totalorder %v429_v24, %v2366_v5  ;;  %vm686_vm3 = vcmp.lt.s32.totalorder %v298_v13, %v2373_v12 }
  0x3a   :  { %vm2624_vm5 = vmpackc.low %vm849_vm9, %vm848_vm4  ;;  %v446_v37 = vadd.s32 3, %v315_v25  ;;  %v38_v38 = vadd.s32 160, %v2362_v1  ;;  %vm558_vm4 = vcmp.gt.s32.totalorder %v430_v26, %v2366_v5  ;;  %vm687_vm9 = vcmp.lt.s32.totalorder %v299_v17, %v2373_v12 }
  0x3b   :  { %v4571_v32 = vsel %vm2624_vm5, 4294967295, %v4570_v32  ;;  %1983 = vmatpush.bf16.msk.msra.mxu3 %vm2624_vm5, %v4404_v35  ;;  %vm798_vm13 = vmand %vm541_vm6, %vm670_vm7  ;;  %v280_v39 = vmul.u32 3, %v22_v28  ;;  %v39_v40 = vadd.s32 168, %v2362_v1  ;;  %v4572_v41 = vmov 0 }
  0x3c   :  { %vm799_vm2 = vmand %vm542_vm12, %vm671_vm14  ;;  %v461_v43 = vadd.s32 3, %v330_v29  ;;  %v281_v45 = vmul.u32 3, %v23_v31  ;;  %vm573_vm7 = vcmp.gt.s32.totalorder %v445_v33, %v2366_v5  ;;  %vm702_vm12 = vcmp.lt.s32.totalorder %v314_v21, %v2373_v12 }
  0x3d   :  { %vm2637_vm0 = vmpackc.low %vm799_vm2, %vm798_vm13  ;;  %v462_v46 = vadd.s32 3, %v331_v34  ;;  %v54_v47 = vadd.s32 288, %v2362_v1  ;;  %vm574_vm13 = vcmp.gt.s32.totalorder %v446_v37, %v2366_v5  ;;  %vm703_vm2 = vcmp.lt.s32.totalorder %v315_v25, %v2373_v12 }
  0x3e   :  { %v4573_v41 = vsel %vm2637_vm0, 4294967295, %v4572_v41  ;;  %1937 = vmatpush.bf16.msk.msra.mxu0 %vm2637_vm0, %v4404_v35  ;;  %vm814_vm6 = vmand %vm557_vm15, %vm686_vm3  ;;  %v296_v49 = vmul.u32 3, %v38_v38  ;;  %v55_v50 = vadd.s32 296, %v2362_v1  ;;  %v4574_v51 = vmov 0 }
  0x3f   :  { %vm815_vm14 = vmand %vm558_vm4, %vm687_vm9  ;;  %v411_v53 = vadd.s32 3, %v280_v39  ;;  %v297_v54 = vmul.u32 3, %v39_v40  ;;  %vm589_vm3 = vcmp.gt.s32.totalorder %v461_v43, %v2366_v5  ;;  %vm718_vm4 = vcmp.lt.s32.totalorder %v330_v29, %v2373_v12 }
  0x40   :  { %vm2650_vm5 = vmpackc.low %vm815_vm14, %vm814_vm6  ;;  %v412_v55 = vadd.s32 3, %v281_v45  ;;  %v70_v56 = vadd.s32 416, %v2362_v1  ;;  %vm590_vm6 = vcmp.gt.s32.totalorder %v462_v46, %v2366_v5  ;;  %vm719_vm14 = vcmp.lt.s32.totalorder %v331_v34, %v2373_v12 }
  0x41   :  { %v4575_v51 = vsel %vm2650_vm5, 4294967295, %v4574_v51  ;;  %1953 = vmatpush.bf16.msk.msra.mxu1 %vm2650_vm5, %v4404_v35  ;;  %vm830_vm15 = vmand %vm573_vm7, %vm702_vm12  ;;  %v312_v58 = vmul.u32 3, %v54_v47  ;;  %v71_v59 = vadd.s32 424, %v2362_v1  ;;  %v4576_v61 = vmov 0 }
  0x42   :  { %vm831_vm9 = vmand %vm574_vm13, %vm703_vm2  ;;  %v427_v62 = vadd.s32 3, %v296_v49  ;;  %v313_v63 = vmul.u32 3, %v55_v50  ;;  %vm539_vm12 = vcmp.gt.s32.totalorder %v411_v53, %v2366_v5  ;;  %vm668_vm13 = vcmp.lt.s32.totalorder %v280_v39, %v2373_v12 }
  0x43   :  { %vm2663_vm0 = vmpackc.low %vm831_vm9, %vm830_vm15  ;;  %v428_v0 = vadd.s32 3, %v297_v54  ;;  %v20_v3 = vadd.s32 16, %v2362_v1  ;;  %vm540_vm15 = vcmp.gt.s32.totalorder %v412_v55, %v2366_v5  ;;  %vm669_vm9 = vcmp.lt.s32.totalorder %v281_v45, %v2373_v12 }
  0x44   :  { %v4577_v61 = vsel %vm2663_vm0, 4294967295, %v4576_v61  ;;  %1969 = vmatpush.bf16.msk.msra.mxu2 %vm2663_vm0, %v4404_v35  ;;  %vm846_vm7 = vmand %vm589_vm3, %vm718_vm4  ;;  %v328_v4 = vmul.u32 3, %v70_v56  ;;  %v21_v7 = vadd.s32 24, %v2362_v1  ;;  %v4579_v8 = vmov 0 }
  0x45   :  { %4578 = vst [vmem:[#allocation5_spill] sm:$0xff] %v4577_v61  ;;  %vm847_vm2 = vmand %vm590_vm6, %vm719_vm14  ;;  %v443_v9 = vadd.s32 3, %v312_v58  ;;  %v329_v10 = vmul.u32 3, %v71_v59  ;;  %vm555_vm4 = vcmp.gt.s32.totalorder %v427_v62, %v2366_v5  ;;  %vm684_vm6 = vcmp.lt.s32.totalorder %v296_v49, %v2373_v12 }
  0x46   :  { %vm2676_vm5 = vmpackc.low %vm847_vm2, %vm846_vm7  ;;  %v444_v13 = vadd.s32 3, %v313_v63  ;;  %v36_v14 = vadd.s32 144, %v2362_v1  ;;  %vm556_vm7 = vcmp.gt.s32.totalorder %v428_v0, %v2366_v5  ;;  %vm685_vm2 = vcmp.lt.s32.totalorder %v297_v54, %v2373_v12 }
  0x47   :  { %v4580_v8 = vsel %vm2676_vm5, 4294967295, %v4579_v8  ;;  %1985 = vmatpush.bf16.msk.msra.mxu3 %vm2676_vm5, %v4404_v35  ;;  %vm796_vm3 = vmand %vm539_vm12, %vm668_vm13  ;;  %v278_v16 = vmul.u32 3, %v20_v3  ;;  %v37_v17 = vadd.s32 152, %v2362_v1  ;;  %v4582_v18 = vmov 0 }
  0x48   :  { %4581 = vst [vmem:[#allocation6_spill] sm:$0xff] %v4580_v8  ;;  %vm797_vm14 = vmand %vm540_vm15, %vm669_vm9  ;;  %v459_v19 = vadd.s32 3, %v328_v4  ;;  %v279_v21 = vmul.u32 3, %v21_v7  ;;  %vm571_vm13 = vcmp.gt.s32.totalorder %v443_v9, %v2366_v5  ;;  %vm700_vm15 = vcmp.lt.s32.totalorder %v312_v58, %v2373_v12 }
  0x49   :  { %vm2689_vm0 = vmpackc.low %vm797_vm14, %vm796_vm3  ;;  %v460_v22 = vadd.s32 3, %v329_v10  ;;  %v52_v24 = vadd.s32 272, %v2362_v1  ;;  %vm572_vm3 = vcmp.gt.s32.totalorder %v444_v13, %v2366_v5  ;;  %vm701_vm14 = vcmp.lt.s32.totalorder %v313_v63, %v2373_v12 }
  0x4a   :  { %v4583_v18 = vsel %vm2689_vm0, 4294967295, %v4582_v18  ;;  %1939 = vmatpush.bf16.msk.msra.mxu0 %vm2689_vm0, %v4404_v35  ;;  %vm812_vm12 = vmand %vm555_vm4, %vm684_vm6  ;;  %v294_v25 = vmul.u32 3, %v36_v14  ;;  %v53_v26 = vadd.s32 280, %v2362_v1  ;;  %v4584_v28 = vmov 0 }
  0x4b   :  { %vm813_vm9 = vmand %vm556_vm7, %vm685_vm2  ;;  %v409_v29 = vadd.s32 3, %v278_v16  ;;  %v295_v31 = vmul.u32 3, %v37_v17  ;;  %vm587_vm6 = vcmp.gt.s32.totalorder %v459_v19, %v2366_v5  ;;  %vm716_vm7 = vcmp.lt.s32.totalorder %v328_v4, %v2373_v12 }
  0x4c   :  { %vm2702_vm5 = vmpackc.low %vm813_vm9, %vm812_vm12  ;;  %v410_v33 = vadd.s32 3, %v279_v21  ;;  %v68_v34 = vadd.s32 400, %v2362_v1  ;;  %vm588_vm12 = vcmp.gt.s32.totalorder %v460_v22, %v2366_v5  ;;  %vm717_vm9 = vcmp.lt.s32.totalorder %v329_v10, %v2373_v12 }
  0x4d   :  { %v4585_v28 = vsel %vm2702_vm5, 4294967295, %v4584_v28  ;;  %1955 = vmatpush.bf16.msk.msra.mxu1 %vm2702_vm5, %v4404_v35  ;;  %vm828_vm4 = vmand %vm571_vm13, %vm700_vm15  ;;  %v310_v37 = vmul.u32 3, %v52_v24  ;;  %v69_v38 = vadd.s32 408, %v2362_v1  ;;  %v4587_v39 = vmov 0 }
  0x4e   :  { %4586 = vst [vmem:[#allocation7_spill] sm:$0xff] %v4585_v28  ;;  %vm829_vm2 = vmand %vm572_vm3, %vm701_vm14  ;;  %v425_v40 = vadd.s32 3, %v294_v25  ;;  %v311_v43 = vmul.u32 3, %v53_v26  ;;  %vm537_vm15 = vcmp.gt.s32.totalorder %v409_v29, %v2366_v5  ;;  %vm666_vm3 = vcmp.lt.s32.totalorder %v278_v16, %v2373_v12 }
  0x4f   :  { %vm2715_vm0 = vmpackc.low %vm829_vm2, %vm828_vm4  ;;  %v426_v45 = vadd.s32 3, %v295_v31  ;;  %vm538_vm5 = vcmp.gt.s32.totalorder %v410_v33, %v2366_v5  ;;  %vm667_vm4 = vcmp.lt.s32.totalorder %v279_v21, %v2373_v12  ;;  %v326_v46 = vmul.u32 3, %v68_v34 }
  0x50   :  { %v4588_v39 = vsel %vm2715_vm0, 4294967295, %v4587_v39  ;;  %1971 = vmatpush.bf16.msk.msra.mxu2 %vm2715_vm0, %v4404_v35  ;;  %vm844_vm13 = vmand %vm587_vm6, %vm716_vm7  ;;  %v19_v47 = vadd.s32 8, %v2362_v1  ;;  %v4590_v49 = vmov 0  ;;  %v441_v50 = vadd.s32 3, %v310_v37 }
  0x51   :  { %4589 = vst [vmem:[#allocation8_spill] sm:$0xff] %v4588_v39  ;;  %vm845_vm14 = vmand %vm588_vm12, %vm717_vm9  ;;  %v327_v53 = vmul.u32 3, %v69_v38  ;;  %vm553_vm7 = vcmp.gt.s32.totalorder %v425_v40, %v2366_v5  ;;  %vm682_vm12 = vcmp.lt.s32.totalorder %v294_v25, %v2373_v12  ;;  %v442_v54 = vadd.s32 3, %v311_v43 }
  0x52   :  { %vm2727_vm2 = vmpackc.low %vm845_vm14, %vm844_vm13  ;;  %v34_v55 = vadd.s32 128, %v2362_v1  ;;  %vm554_vm13 = vcmp.gt.s32.totalorder %v426_v45, %v2366_v5  ;;  %vm683_vm14 = vcmp.lt.s32.totalorder %v295_v31, %v2373_v12  ;;  %v276_v56 = vmul.u32 3, %v2362_v1 }
  0x53   :  { %v4591_v49 = vsel %vm2727_vm2, 4294967295, %v4590_v49  ;;  %1987 = vmatpush.bf16.msk.msra.mxu3 %vm2727_vm2, %v4404_v35  ;;  %vm794_vm6 = vmand %vm537_vm15, %vm666_vm3  ;;  %v35_v58 = vadd.s32 136, %v2362_v1  ;;  %v4593_v59 = vmov 0  ;;  %v457_v62 = vadd.s32 3, %v326_v46 }
  0x54   :  { %4592 = vst [vmem:[#allocation9_spill] sm:$0xff] %v4591_v49  ;;  %vm795_vm9 = vmand %vm538_vm5, %vm667_vm4  ;;  %v277_v63 = vmul.u32 3, %v19_v47  ;;  %vm569_vm5 = vcmp.gt.s32.totalorder %v441_v50, %v2366_v5  ;;  %vm698_vm3 = vcmp.lt.s32.totalorder %v310_v37, %v2373_v12  ;;  %v458_v0 = vadd.s32 3, %v327_v53 }
  0x55   :  { %vm2741_vm0 = vmpackc.low %vm795_vm9, %vm794_vm6  ;;  %v50_v3 = vadd.s32 256, %v2362_v1  ;;  %vm570_vm6 = vcmp.gt.s32.totalorder %v442_v54, %v2366_v5  ;;  %vm699_vm9 = vcmp.lt.s32.totalorder %v311_v43, %v2373_v12  ;;  %v292_v4 = vmul.u32 3, %v34_v55 }
  0x56   :  { %v4594_v59 = vsel %vm2741_vm0, 4294967295, %v4593_v59  ;;  %1941 = vmatpush.bf16.msk.msra.mxu0 %vm2741_vm0, %v4404_v35  ;;  %vm810_vm15 = vmand %vm553_vm7, %vm682_vm12  ;;  %v51_v7 = vadd.s32 264, %v2362_v1  ;;  %v4596_v9 = vmov 0  ;;  %v407_v10 = vadd.s32 3, %v276_v56 }
  0x57   :  { %4595 = vst [vmem:[#allocation10_spill] sm:$0xff] %v4594_v59  ;;  %vm811_vm4 = vmand %vm554_vm13, %vm683_vm14  ;;  %v293_v13 = vmul.u32 3, %v35_v58  ;;  %vm585_vm12 = vcmp.gt.s32.totalorder %v457_v62, %v2366_v5  ;;  %vm714_vm13 = vcmp.lt.s32.totalorder %v326_v46, %v2373_v12  ;;  %v408_v14 = vadd.s32 3, %v277_v63 }
  0x58   :  { %vm2754_vm2 = vmpackc.low %vm811_vm4, %vm810_vm15  ;;  %v66_v16 = vadd.s32 384, %v2362_v1  ;;  %vm586_vm15 = vcmp.gt.s32.totalorder %v458_v0, %v2366_v5  ;;  %vm715_vm4 = vcmp.lt.s32.totalorder %v327_v53, %v2373_v12  ;;  %v308_v17 = vmul.u32 3, %v50_v3 }
  0x59   :  { %v4597_v9 = vsel %vm2754_vm2, 4294967295, %v4596_v9  ;;  %1957 = vmatpush.bf16.msk.msra.mxu1 %vm2754_vm2, %v4404_v35  ;;  %vm826_vm7 = vmand %vm569_vm5, %vm698_vm3  ;;  %v67_v19 = vadd.s32 392, %v2362_v1  ;;  %v4599_v21 = vmov 0  ;;  %vm2772_vm5 = vcmp.lt.s32.totalorder %v276_v56, %v2373_v12  ;;  %v2912_v56 = vld [vmem:[%s4337_s0] sm:$0xff] }
  0x5a   :  { %4598 = vst [vmem:[#allocation11_spill] sm:$0xff] %v4597_v9  ;;  %vm827_vm14 = vmand %vm570_vm6, %vm699_vm9  ;;  %v423_v24 = vadd.s32 3, %v292_v4  ;;  %v309_v25 = vmul.u32 3, %v51_v7  ;;  %vm535_vm6 = vcmp.gt.s32.totalorder %v407_v10, %v2366_v5  ;;  %v424_v26 = vadd.s32 3, %v293_v13 }
  0x5b   :  { %vm2767_vm0 = vmpackc.low %vm827_vm14, %vm826_vm7  ;;  %v96_v29 = vadd.s32 624, %v2362_v1  ;;  %v97_v31 = vadd.s32 632, %v2362_v1  ;;  %vm536_vm7 = vcmp.gt.s32.totalorder %v408_v14, %v2366_v5  ;;  %vm665_vm14 = vcmp.lt.s32.totalorder %v277_v63, %v2373_v12  ;;  %1244 = vst [vmem:[#allocation1] ss:$4 sm:$0xff] %v2912_v56 }
  0x5c   :  { %v4600_v21 = vsel %vm2767_vm0, 4294967295, %v4599_v21  ;;  %1973 = vmatpush.bf16.msk.msra.mxu2 %vm2767_vm0, %v4404_v35  ;;  %vm842_vm3 = vmand %vm585_vm12, %vm714_vm13  ;;  %v324_v33 = vmul.u32 3, %v66_v16  ;;  %v4604_v34 = vmov 0  ;;  %vm2789_vm0 = vcmp.lt.s32.totalorder %v292_v4, %v2373_v12 }
  0x5d   :  { %4601 = vst [vmem:[#allocation12_spill] sm:$0xff] %v4600_v21  ;;  %vm843_vm9 = vmand %vm586_vm15, %vm715_vm4  ;;  %v439_v38 = vadd.s32 3, %v308_v17  ;;  %v325_v40 = vmul.u32 3, %v67_v19  ;;  %vm551_vm13 = vcmp.gt.s32.totalorder %v423_v24, %v2366_v5  ;;  %vm2800_vm15 = vcmp.lt.s32.totalorder %v293_v13, %v2373_v12 }
  0x5e   :  { %vm2784_vm2 = vmpackc.low %vm843_vm9, %vm842_vm3  ;;  %v440_v45 = vadd.s32 3, %v309_v25  ;;  %v112_v46 = vadd.s32 752, %v2362_v1  ;;  %vm552_vm3 = vcmp.gt.s32.totalorder %v424_v26, %v2366_v5  ;;  %v354_v47 = vmul.u32 3, %v96_v29 }
  0x5f   :  { %v4605_v34 = vsel %vm2784_vm2, 4294967295, %v4604_v34  ;;  %1989 = vmatpush.bf16.msk.msra.mxu3 %vm2784_vm2, %v4404_v35  ;;  %vm792_vm12 = vmand %vm535_vm6, %vm2772_vm5  ;;  %v355_v50 = vmul.u32 3, %v97_v31  ;;  %v113_v53 = vadd.s32 760, %v2362_v1  ;;  %v4611_v54 = vmov 0 }
  0x60   :  { %4606 = vst [vmem:[#allocation13_spill] sm:$0xff] %v4605_v34  ;;  %vm793_vm4 = vmand %vm536_vm7, %vm665_vm14  ;;  %vm2812_vm5 = vcmp.lt.s32.totalorder %v308_v17, %v2373_v12  ;;  %vm2817_vm6 = vcmp.lt.s32.totalorder %v309_v25, %v2373_v12  ;;  %v455_v58 = vadd.s32 3, %v324_v33  ;;  %v128_v62 = vadd.s32 880, %v2362_v1  ;;  %v3104_v34 = vld [vmem:[%s4337_s0 + $0x8] sm:$0xff] }
  0x61   :  { %vm2807_vm9 = vmpackc.low %vm793_vm4, %vm792_vm12  ;;  %vm567_vm14 = vcmp.gt.s32.totalorder %v439_v38, %v2366_v5  ;;  %v456_v63 = vadd.s32 3, %v325_v40  ;;  %vm2831_vm12 = vcmp.lt.s32.totalorder %v324_v33, %v2373_v12  ;;  %v129_v3 = vadd.s32 888, %v2362_v1  ;;  %1246 = vst [vmem:[#allocation1 + $0x20] ss:$4 sm:$0xff] %v3104_v34 }
  0x62   :  { %v4612_v54 = vsel %vm2807_vm9, 4294967295, %v4611_v54  ;;  %1943 = vmatpush.bf16.msk.msra.mxu0 %vm2807_vm9, %v4404_v35  ;;  %vm808_vm7 = vmand %vm551_vm13, %vm2789_vm0  ;;  %vm568_vm2 = vcmp.gt.s32.totalorder %v440_v45, %v2366_v5  ;;  %vm2842_vm9 = vcmp.lt.s32.totalorder %v325_v40, %v2373_v12  ;;  %v370_v7 = vmul.u32 3, %v112_v46 }
  0x63   :  { %4613 = vst [vmem:[#allocation14_spill] sm:$0xff] %v4612_v54  ;;  %vm809_vm4 = vmand %vm552_vm3, %vm2800_vm15  ;;  %v144_v10 = vadd.s32 1008, %v2362_v1  ;;  %v4622_v13 = vmov 0  ;;  %v485_v14 = vadd.s32 3, %v354_v47  ;;  %v486_v16 = vadd.s32 3, %v355_v50 }
  0x64   :  { %vm2847_vm0 = vmpackc.low %vm809_vm4, %vm808_vm7  ;;  %v371_v17 = vmul.u32 3, %v113_v53  ;;  %v145_v19 = vadd.s32 1016, %v2362_v1  ;;  %vm583_vm15 = vcmp.gt.s32.totalorder %v455_v58, %v2366_v5  ;;  %vm2861_vm3 = vcmp.lt.s32.totalorder %v354_v47, %v2373_v12  ;;  %v1248_v54 = vld.sshfl [vmem:[#allocation1 + $0x8] sm:$0xff pattern:$0x73625140] }
  0x65   :  { %v4623_v13 = vsel %vm2847_vm0, 4294967295, %v4622_v13  ;;  %1959 = vmatpush.bf16.msk.msra.mxu1 %vm2847_vm0, %v4404_v35  ;;  %vm824_vm13 = vmand %vm567_vm14, %vm2812_vm5  ;;  %vm2866_vm7 = vcmp.lt.s32.totalorder %v355_v50, %v2373_v12  ;;  %v386_v25 = vmul.u32 3, %v128_v62  ;;  %vm584_vm5 = vcmp.gt.s32.totalorder %v456_v63, %v2366_v5 }
  0x66   :  { %4624 = vst [vmem:[#allocation15_spill] sm:$0xff] %v4623_v13  ;;  %vm825_vm4 = vmand %vm568_vm2, %vm2817_vm6  ;;  %v387_v26 = vmul.u32 3, %v129_v3  ;;  %v94_v29 = vadd.s32 608, %v2362_v1  ;;  %v95_v31 = vadd.s32 616, %v2362_v1  ;;  %v4629_v33 = vmov 0 }
  0x67   :  { %vm2877_vm14 = vmpackc.low %vm825_vm4, %vm824_vm13  ;;  %v501_v37 = vadd.s32 3, %v370_v7  ;;  %v402_v38 = vmul.u32 3, %v144_v10  ;;  %v110_v40 = vadd.s32 736, %v2362_v1  ;;  %v2883_v43 = vadd.s32 744, %v2362_v1 }
  0x68   :  { %v4630_v33 = vsel %vm2877_vm14, 4294967295, %v4629_v33  ;;  %1975 = vmatpush.bf16.msk.msra.mxu2 %vm2877_vm14, %v4404_v35  ;;  %vm840_vm2 = vmand %vm583_vm15, %vm2831_vm12  ;;  %vm613_vm6 = vcmp.gt.s32.totalorder %v485_v14, %v2366_v5  ;;  %vm614_vm13 = vcmp.gt.s32.totalorder %v486_v16, %v2366_v5  ;;  %v502_v45 = vadd.s32 3, %v371_v17  ;;  %v1252_v9 = vld.sshfl [vmem:[#allocation1 + $0x28] sm:$0xff pattern:$0x73625140] }
  0x69   :  { %4631 = vst [vmem:[#allocation16_spill] sm:$0xff] %v4630_v33  ;;  %v403_v46 = vmul.u32 3, %v145_v19  ;;  %vm841_vm4 = vmand %vm584_vm5, %vm2842_vm9  ;;  %vm2899_vm0 = vcmp.lt.s32.totalorder %v370_v7, %v2373_v12  ;;  %vm2904_vm14 = vcmp.lt.s32.totalorder %v371_v17, %v2373_v12  ;;  %v517_v53 = vadd.s32 3, %v386_v25 }
  0x6a   :  { %v126_v55 = vadd.s32 864, %v2362_v1  ;;  %vm2914_vm12 = vmpackc.low %vm841_vm4, %vm840_vm2  ;;  %v4636_v58 = vmov 0  ;;  %v518_v62 = vadd.s32 3, %v387_v26  ;;  %vm2919_vm9 = vcmp.lt.s32.totalorder %v386_v25, %v2373_v12 }
  0x6b   :  { %v4637_v58 = vsel %vm2914_vm12, 4294967295, %v4636_v58  ;;  %v352_v0 = vmul.u32 3, %v94_v29  ;;  %v353_v3 = vmul.u32 3, %v95_v31  ;;  %1991 = vmatpush.bf16.msk.msra.mxu3 %vm2914_vm12, %v4404_v35  ;;  %vm870_vm15 = vmand %vm613_vm6, %vm2861_vm3  ;;  %vm629_vm5 = vcmp.gt.s32.totalorder %v501_v37, %v2366_v5 }
  0x6c   :  { %4638 = vst [vmem:[#allocation17_spill] sm:$0xff] %v4637_v58  ;;  %v533_v4 = vadd.s32 3, %v402_v38  ;;  %v368_v7 = vmul.u32 3, %v110_v40  ;;  %v369_v10 = vmul.u32 3, %v2883_v43  ;;  %vm871_vm2 = vmand %vm614_vm13, %vm2866_vm7  ;;  %vm630_vm4 = vcmp.gt.s32.totalorder %v502_v45, %v2366_v5 }
  0x6d   :  { %vm2939_vm12 = vcmp.lt.s32.totalorder %v387_v26, %v2373_v12  ;;  %v534_v14 = vadd.s32 3, %v403_v46  ;;  %v127_v19 = vadd.s32 872, %v2362_v1  ;;  %vm2944_vm3 = vmpackc.low %vm871_vm2, %vm870_vm15  ;;  %v4643_v22 = vmov 0 }
  0x6e   :  { %v4644_v22 = vsel %vm2944_vm3, 4294967295, %v4643_v22  ;;  %v384_v24 = vmul.u32 3, %v126_v55  ;;  %v142_v16 = vadd.s32 992, %v2362_v1  ;;  %v143_v25 = vadd.s32 1000, %v2362_v1  ;;  %1993 = vmatpush.bf16.msk.msrb.mxu0 %vm2944_vm3, %v4404_v35  ;;  %vm886_vm7 = vmand %vm629_vm5, %vm2899_vm0 }
  0x6f   :  { %4645 = vst [vmem:[#allocation18_spill] sm:$0xff] %v4644_v22  ;;  %vm2960_vm15 = vcmp.lt.s32.totalorder %v402_v38, %v2373_v12  ;;  %v483_v29 = vadd.s32 3, %v352_v0  ;;  %v484_v31 = vadd.s32 3, %v353_v3  ;;  %vm887_vm2 = vmand %vm630_vm4, %vm2904_vm14  ;;  %vm2970_vm3 = vcmp.lt.s32.totalorder %v403_v46, %v2373_v12 }
  0x70   :  { %v499_v40 = vadd.s32 3, %v368_v7  ;;  %v500_v43 = vadd.s32 3, %v369_v10  ;;  %vm2974_vm0 = vmpackc.low %vm887_vm2, %vm886_vm7  ;;  %v4650_v38 = vmov 0  ;;  %vm2980_vm13 = vcmp.lt.s32.totalorder %v352_v0, %v2373_v12 }
  0x71   :  { %v4651_v38 = vsel %vm2974_vm0, 4294967295, %v4650_v38  ;;  %v385_v45 = vmul.u32 3, %v127_v19  ;;  %v92_v50 = vadd.s32 592, %v2362_v1  ;;  %2009 = vmatpush.bf16.msk.msrb.mxu1 %vm2974_vm0, %v4404_v35  ;;  %vm4655_vm14 = vcmp.gt.s32.totalorder %v517_v53, %v2366_v5 }
  0x72   :  { %4652 = vst [vmem:[#allocation19_spill] sm:$0xff] %v4651_v38  ;;  %vm902_vm4 = vmand %vm4655_vm14, %vm2919_vm9  ;;  %vm2993_vm7 = vcmp.lt.s32.totalorder %v353_v3, %v2373_v12  ;;  %v2997_v55 = vadd.s32 3, %v384_v24  ;;  %v400_v0 = vmul.u32 3, %v142_v16  ;;  %v401_v19 = vmul.u32 3, %v143_v25 }
  0x73   :  { %vm4658_vm2 = vcmp.gt.s32.totalorder %v518_v62, %v2366_v5  ;;  %vm611_vm6 = vcmp.gt.s32.totalorder %v483_v29, %v2366_v5  ;;  %vm3006_vm9 = vcmp.lt.s32.totalorder %v368_v7, %v2373_v12  ;;  %v93_v63 = vadd.s32 600, %v2362_v1 }
  0x74   :  { %vm903_vm5 = vmand %vm4658_vm2, %vm2939_vm12  ;;  %v4661_v3 = vmov 0  ;;  %vm3018_vm12 = vcmp.lt.s32.totalorder %v369_v10, %v2373_v12  ;;  %vm3023_vm2 = vcmp.lt.s32.totalorder %v384_v24, %v2373_v12  ;;  %v516_v17 = vadd.s32 3, %v385_v45 }
  0x75   :  { %vm3011_vm14 = vmpackc.low %vm903_vm5, %vm902_vm4  ;;  %vm4668_vm5 = vcmp.gt.s32.totalorder %v533_v4, %v2366_v5  ;;  %v350_v16 = vmul.u32 3, %v92_v50  ;;  %v108_v10 = vadd.s32 720, %v2362_v1  ;;  %v109_v25 = vadd.s32 728, %v2362_v1 }
  0x76   :  { %v4662_v3 = vsel %vm3011_vm14, 4294967295, %v4661_v3  ;;  %2025 = vmatpush.bf16.msk.msrb.mxu2 %vm3011_vm14, %v4404_v35  ;;  %vm918_vm4 = vmand %vm4668_vm5, %vm2960_vm15  ;;  %vm4669_vm10 = vcmp.gt.s32.totalorder %v534_v14, %v2366_v5  ;;  %v531_v24 = vadd.s32 3, %v400_v0  ;;  %v3042_v35 = vadd.s32 3, %v401_v19 }
  0x77   :  { %4663 = vst [vmem:[#allocation20_spill] sm:$0xff] %v4662_v3  ;;  %vm919_vm8 = vmand %vm4669_vm10, %vm2970_vm3  ;;  %v3045_v4 = vadd.s32 848, %v2362_v1  ;;  %v4670_v26 = vmov 0  ;;  %vm3052_vm5 = vcmp.lt.s32.totalorder %v385_v45, %v2373_v12  ;;  %v351_v14 = vmul.u32 3, %v93_v63 }
  0x78   :  { %vm3047_vm15 = vmpackc.low %vm919_vm8, %vm918_vm4  ;;  %v125_v37 = vadd.s32 856, %v2362_v1  ;;  %v3058_v58 = vadd.s32 976, %v2362_v1  ;;  %v4675_v3 = vmov 1.0|1.0   ;;  %vm3068_vm10 = vcmp.lt.s32.totalorder %v400_v0, %v2373_v12 }
  0x79   :  { %v4671_v26 = vsel %vm3047_vm15, 4294967295, %v4670_v26  ;;  %2041 = vmatpush.bf16.msk.msrb.mxu3 %vm3047_vm15, %v4675_v3  ;;  %vm868_vm8 = vmand %vm611_vm6, %vm2980_vm13  ;;  %vm3073_vm3 = vcmp.lt.s32.totalorder %v401_v19, %v2373_v12  ;;  %v3078_v33 = vadd.s32 984, %v2362_v1  ;;  %vm4680_vm6 = vcmp.gt.s32.totalorder %v484_v31, %v2366_v5  ;;  %v1250_v45 = vld.sshfl [vmem:[#allocation1 + $0x18] sm:$0xff pattern:$0x73625140] }
  0x7a   :  { %4672 = vst [vmem:[#allocation21_spill] sm:$0xff] %v4671_v26  ;;  %v3081_v26 = vadd.s32 576, %v2362_v1  ;;  %vm869_vm13 = vmand %vm4680_vm6, %vm2993_vm7  ;;  %vm644_vm4 = vcmp.gt.s32.totalorder %v516_v17, %v2366_v5  ;;  %v3088_v29 = vadd.s32 3, %v350_v16  ;;  %v366_v47 = vmul.u32 3, %v108_v10 }
  0x7b   :  { %v367_v0 = vmul.u32 3, %v109_v25  ;;  %vm3090_vm0 = vmpackc.low %vm869_vm13, %vm868_vm8  ;;  %v4681_v19 = vmov 0  ;;  %v382_v46 = vmul.u32 3, %v3045_v4  ;;  %v3099_v31 = vadd.s32 584, %v2362_v1 }
  0x7c   :  { %v4682_v19 = vsel %vm3090_vm0, 4294967295, %v4681_v19  ;;  %1995 = vmatpush.bf16.msk.msrb.mxu0 %vm3090_vm0, %v4675_v3  ;;  %vm4684_vm7 = vcmp.gt.s32.totalorder %v499_v40, %v2366_v5  ;;  %v482_v10 = vadd.s32 3, %v351_v14  ;;  %v383_v25 = vmul.u32 3, %v125_v37 }
  0x7d   :  { %4683 = vst [vmem:[#allocation22_spill] sm:$0xff] %v4682_v19  ;;  %vm884_vm8 = vmand %vm4684_vm7, %vm3006_vm9  ;;  %v398_v4 = vmul.u32 3, %v3058_v58  ;;  %v3115_v38 = vadd.s32 704, %v2362_v1  ;;  %vm4685_vm6 = vcmp.gt.s32.totalorder %v500_v43, %v2366_v5  ;;  %vm3123_vm14 = vcmp.lt.s32.totalorder %v350_v16, %v2373_v12 }
  0x7e   :  { %vm885_vm13 = vmand %vm4685_vm6, %vm3018_vm12  ;;  %v399_v40 = vmul.u32 3, %v3078_v33  ;;  %v348_v37 = vmul.u32 3, %v3081_v26  ;;  %v3130_v58 = vadd.s32 712, %v2362_v1  ;;  %v4688_v19 = vmov 0 }
  0x7f   :  { %vm3132_vm9 = vmpackc.low %vm885_vm13, %vm884_vm8  ;;  %vm3139_vm12 = vcmp.lt.s32.totalorder %v351_v14, %v2373_v12  ;;  %v497_v62 = vadd.s32 3, %v366_v47  ;;  %v3143_v16 = vadd.s32 3, %v367_v0  ;;  %vm4693_vm8 = vcmp.gt.s32.totalorder %v2997_v55, %v2366_v5 }
  0x80   :  { %v4689_v19 = vsel %vm3132_vm9, 4294967295, %v4688_v19  ;;  %2011 = vmatpush.bf16.msk.msrb.mxu1 %vm3132_vm9, %v4675_v3  ;;  %vm900_vm6 = vmand %vm4693_vm8, %vm3023_vm2  ;;  %vm3154_vm13 = vcmp.lt.s32.totalorder %v366_v47, %v2373_v12  ;;  %v3158_v26 = vadd.s32 3, %v382_v46  ;;  %v349_v14 = vmul.u32 3, %v3099_v31 }
  0x81   :  { %4690 = vst [vmem:[#allocation23_spill] sm:$0xff] %v4689_v19  ;;  %v3162_v13 = vadd.s32 832, %v2362_v1  ;;  %vm901_vm7 = vmand %vm644_vm4, %vm3052_vm5  ;;  %v3169_v55 = vadd.s32 3, %v383_v25  ;;  %v3171_v7 = vadd.s32 3, %v398_v4  ;;  %v364_v47 = vmul.u32 3, %v3115_v38 }
  0x82   :  { %v1247_v19 = vld.sshfl [vmem:[#allocation1] sm:$0xff pattern:$0x73625140]  ;;  %vm3174_vm2 = vmpackc.low %vm901_vm7, %vm900_vm6  ;;  %v4696_v22 = vmov 0  ;;  %vm3179_vm8 = vcmp.lt.s32.totalorder %v367_v0, %v2373_v12  ;;  %v3183_v17 = vadd.s32 3, %v399_v40  ;;  %v3185_v50 = vadd.s32 3, %v348_v37 }
  0x83   :  { %v4697_v22 = vsel %vm3174_vm2, 4294967295, %v4696_v22  ;;  %v365_v21 = vmul.u32 3, %v3130_v58  ;;  %2027 = vmatpush.bf16.msk.msrb.mxu2 %vm3174_vm2, %v4675_v3  ;;  %vm4701_vm5 = vcmp.gt.s32.totalorder %v531_v24, %v2366_v5  ;;  %vm3199_vm15 = vcmp.lt.s32.totalorder %v382_v46, %v2373_v12  ;;  %v1249_v58 = vld.sshfl [vmem:[#allocation1 + $0x10] sm:$0xff pattern:$0x73625140] }
  0x84   :  { %4698 = vst [vmem:[#allocation24_spill] sm:$0xff] %v4697_v22  ;;  %vm916_vm4 = vmand %vm4701_vm5, %vm3068_vm10  ;;  %vm3204_vm9 = vcmp.lt.s32.totalorder %v383_v25, %v2373_v12  ;;  %vm4706_vm10 = vcmp.gt.s32.totalorder %v3042_v35, %v2366_v5  ;;  %v3215_v24 = vadd.s32 3, %v349_v14  ;;  %v3218_v46 = vadd.s32 840, %v2362_v1  ;;  %v1251_v22 = vld.sshfl [vmem:[#allocation1 + $0x20] sm:$0xff pattern:$0x73625140] }
  0x85   :  { %vm917_vm5 = vmand %vm4706_vm10, %vm3073_vm3  ;;  %v4707_v49 = vmov 0  ;;  %vm3228_vm3 = vcmp.lt.s32.totalorder %v398_v4, %v2373_v12  ;;  %vm3233_vm10 = vcmp.lt.s32.totalorder %v399_v40, %v2373_v12  ;;  %v3238_v25 = vadd.s32 960, %v2362_v1  ;;  %v1253_v40 = vld.sshfl [vmem:[#allocation1 + $0x30] sm:$0xff pattern:$0x73625140] }
  0x86   :  { %vm3221_vm7 = vmpackc.low %vm917_vm5, %vm916_vm4  ;;  %vm4714_vm4 = vcmp.gt.s32.totalorder %v3088_v29, %v2366_v5  ;;  %v3250_v4 = vadd.s32 3, %v364_v47  ;;  %v3252_v39 = vpack.c.bf16 %v1248_v54, %v1247_v19  ;;  %v3254_v59 = vpack.c.bf16 %v1250_v45, %v1249_v58  ;;  %v1254_v19 = vld.sshfl [vmem:[#allocation1 + $0x38] sm:$0xff pattern:$0x73625140] }
  0x87   :  { %v4708_v49 = vsel %vm3221_vm7, 4294967295, %v4707_v49  ;;  %2043 = vmatpush.bf16.msk.msrb.mxu3 %vm3221_vm7, %v4675_v3  ;;  %vm866_vm5 = vmand %vm4714_vm4, %vm3123_vm14  ;;  %vm4717_vm6 = vcmp.gt.s32.totalorder %v482_v10, %v2366_v5  ;;  %vm3265_vm4 = vcmp.lt.s32.totalorder %v348_v37, %v2373_v12  ;;  %v3269_v54 = vadd.s32 3, %v365_v21 }
  0x88   :  { %4709 = vst [vmem:[#allocation25_spill] sm:$0xff] %v4708_v49  ;;  %vm867_vm7 = vmand %vm4717_vm6, %vm3139_vm12  ;;  %v3271_v53 = vpack.c.bf16 %v1252_v9, %v1251_v22  ;;  %v4721_v43 = vmov 0  ;;  %vm3280_vm6 = vcmp.lt.s32.totalorder %v349_v14, %v2373_v12  ;;  %v4726_v58 = vmul.u32 3, %v3162_v13 }
  0x89   :  { %4715 = vst [vmem:[#allocation26_spill] sm:$0xff] %v3252_v39  ;;  %vm3273_vm2 = vmpackc.low %vm867_vm7, %vm866_vm5  ;;  %v3290_v9 = vadd.s32 968, %v2362_v1  ;;  %v3292_v22 = vpack.c.bf16 %v1254_v19, %v1253_v40  ;;  %vm4728_vm7 = vcmp.gt.s32.totalorder %v497_v62, %v2366_v5  ;;  %v3303_v37 = vadd.s32 560, %v2362_v1 }
  0x8a   :  { %4716 = vst [vmem:[#allocation27_spill] sm:$0xff] %v3254_v59  ;;  %v4722_v43 = vsel %vm3273_vm2, 4294967295, %v4721_v43  ;;  %v3287_v45 = vadd.s32 3, %v4726_v58  ;;  %1997 = vmatpush.bf16.msk.msrb.mxu0 %vm3273_vm2, %v4675_v3  ;;  %vm882_vm5 = vmand %vm4728_vm7, %vm3154_vm13  ;;  %v3306_v58 = vadd.s32 568, %v2362_v1  ;;  %v3309_v40 = vadd.s32 688, %v2362_v1 }
  0x8b   :  { %4720 = vst [vmem:[#allocation28_spill] sm:$0xff] %v3271_v53  ;;  %vm4729_vm12 = vcmp.gt.s32.totalorder %v3143_v16, %v2366_v5  ;;  %vm3319_vm7 = vcmp.lt.s32.totalorder %v364_v47, %v2373_v12  ;;  %v1267_v33 = vunpack.c.l.bf16 %v3252_v39  ;;  %v1268_v19 = vunpack.c.h.bf16 %v3252_v39 }
  0x8c   :  { %4723 = vst [vmem:[#allocation29_spill] sm:$0xff] %v4722_v43  ;;  %vm883_vm14 = vmand %vm4729_vm12, %vm3179_vm8  ;;  %v1269_v14 = vunpack.c.l.bf16 %v3254_v59  ;;  %v1270_v31 = vunpack.c.h.bf16 %v3254_v59  ;;  %v4732_v49 = vmov 0  ;;  %vm3332_vm8 = vcmp.lt.s32.totalorder %v365_v21, %v2373_v12 }
  0x8d   :  { %4727 = vst [vmem:[#allocation30_spill] sm:$0xff] %v3292_v22  ;;  %vm3327_vm0 = vmpackc.low %vm883_vm14, %vm882_vm5  ;;  %v3337_v47 = vadd.s32 696, %v2362_v1  ;;  %v1271_v43 = vunpack.c.l.bf16 %v3271_v53  ;;  %v1272_v8 = vunpack.c.h.bf16 %v3271_v53  ;;  %v1273_v39 = vunpack.c.l.bf16 %v3292_v22 }
  0x8e   :  { %v4733_v49 = vsel %vm3327_vm0, 4294967295, %v4732_v49  ;;  %2013 = vmatpush.bf16.msk.msrb.mxu1 %vm3327_vm0, %v4675_v3  ;;  %vm4737_vm14 = vcmp.gt.s32.totalorder %v3158_v26, %v2366_v5  ;;  %v1274_v21 = vunpack.c.h.bf16 %v3292_v22  ;;  %v1283_v59 = vrot.slane %v1268_v19, 6 }
  0x8f   :  { %4734 = vst [vmem:[#allocation31_spill] sm:$0xff] %v4733_v49  ;;  %vm898_vm12 = vmand %vm4737_vm14, %vm3199_vm15  ;;  %v1284_v28 = vrot.slane %v1269_v14, 4  ;;  %v1285_v61 = vrot.slane %v1270_v31, 2  ;;  %vm4738_vm5 = vcmp.gt.s32.totalorder %v3169_v55, %v2366_v5  ;;  %v1286_v53 = vrot.slane %v1272_v8, 6 }
  0x90   :  { %vm899_vm13 = vmand %vm4738_vm5, %vm3204_vm9  ;;  %v1287_v49 = vrot.slane %v1273_v39, 4  ;;  %vm4479_vm0 = vcmask 1041408   ;;  %vm4480_vm2 = vcmask 1045508   ;;  %v4739_v38 = vmov 0 }
  0x91   :  { %vm3356_vm1 = vmpackc.low %vm899_vm13, %vm898_vm12  ;;  %v1288_v26 = vrot.slane %v1274_v21, 2  ;;  %v1290_v22 = vsel %vm4479_vm0, %v1267_v33, %v1283_v59  ;;  %v1292_v14 = vsel %vm4480_vm2, %v1284_v28, %v1285_v61  ;;  %vm4478_vm15 = vcmask 1043456  }
  0x92   :  { %v4740_v38 = vsel %vm3356_vm1, 4294967295, %v4739_v38  ;;  %2029 = vmatpush.bf16.msk.msrb.mxu2 %vm3356_vm1, %v4675_v3  ;;  %vm4741_vm9 = vcmp.gt.s32.totalorder %v3171_v7, %v2366_v5  ;;  %v397_v8 = vmul.u32 3, %v3290_v9  ;;  %v3372_v39 = vadd.s32 816, %v2362_v1 }
  0x93   :  { %vm914_vm14 = vmand %vm4741_vm9, %vm3228_vm3  ;;  %v1294_v59 = vsel %vm4478_vm15, %v1290_v22, %v1292_v14  ;;  %v1295_v61 = vsel %vm4479_vm0, %v1271_v43, %v1286_v53  ;;  %vm4742_vm13 = vcmp.gt.s32.totalorder %v3183_v17, %v2366_v5  ;;  %v4743_v28 = vmul.u32 3, %v3218_v46 }
  0x94   :  { %vm915_vm12 = vmand %vm4742_vm13, %vm3233_vm10  ;;  %v346_v7 = vmul.u32 3, %v3303_v37  ;;  %v1296_v0 = vsel %vm4480_vm2, %v1287_v49, %v1288_v26  ;;  %v3386_v35 = vsub.f32 %v2912_v56, %v1294_v59  ;;  %v4744_v9 = vmov 0 }
  0x95   :  { %v512_v55 = vadd.s32 3, %v4743_v28  ;;  %vm3388_vm3 = vmpackc.low %vm915_vm12, %vm914_vm14  ;;  %v347_v63 = vmul.u32 3, %v3306_v58  ;;  %v362_v53 = vmul.u32 3, %v3309_v40  ;;  %v363_v17 = vmul.u32 3, %v3337_v47 }
  0x96   :  { %v4745_v9 = vsel %vm3388_vm3, 4294967295, %v4744_v9  ;;  %v1297_v43 = vsel %vm4478_vm15, %v1295_v61, %v1296_v0  ;;  %2045 = vmatpush.bf16.msk.msrb.mxu3 %vm3388_vm3, %v4675_v3  ;;  %vm4746_vm10 = vcmp.gt.s32.totalorder %v3185_v50, %v2366_v5  ;;  %v4747_v49 = vmul.u32 3, %v3162_v13  ;;  %1304 = vst [vmem:[#allocation1] ss:$4 sm:$0xff] %v3386_v35 }
  0x97   :  { %vm864_vm5 = vmand %vm4746_vm10, %vm3265_vm4  ;;  %v4750_v37 = vmul.u32 3, %v3238_v25  ;;  %v121_v58 = vadd.s32 824, %v2362_v1  ;;  %v3415_v40 = vsub.f32 %v3104_v34, %v1297_v43  ;;  %vm4751_vm4 = vcmp.gt.s32.totalorder %v3215_v24, %v2366_v5 }
  0x98   :  { %vm3407_vm9 = vcmp.lt.s32.totalorder %v4747_v49, %v2373_v12  ;;  %vm865_vm14 = vmand %vm4751_vm4, %vm3280_vm6  ;;  %vm624_vm13 = vcmp.gt.s32.totalorder %v3269_v54, %v2366_v5  ;;  %v528_v13 = vadd.s32 3, %v397_v8  ;;  %v378_v50 = vmul.u32 3, %v3372_v39 }
  0x99   :  { %v527_v22 = vadd.s32 3, %v4750_v37  ;;  %v136_v29 = vadd.s32 944, %v2362_v1  ;;  %vm3427_vm12 = vmpackc.low %vm865_vm14, %vm864_vm5  ;;  %v4752_v33 = vmov 0  ;;  %v4754_v34 = vmov %v4743_v28  ;;  %1306 = vst [vmem:[#allocation1 + $0x20] ss:$4 sm:$0xff] %v3415_v40 }
  0x9a   :  { %v4753_v33 = vsel %vm3427_vm12, 4294967295, %v4752_v33  ;;  %vm3437_vm6 = vcmp.lt.s32.totalorder %v4754_v34, %v2373_v12  ;;  %v477_v10 = vadd.s32 3, %v346_v7  ;;  %1999 = vmatpush.bf16.msk.msrb.mxu0 %vm3427_vm12, %v4675_v3  ;;  %vm4757_vm5 = vcmp.gt.s32.totalorder %v3250_v4, %v2366_v5  ;;  %vm881_vm0 = vmand %vm624_vm13, %vm3332_vm8 }
  0x9b   :  { %vm880_vm4 = vmand %vm4757_vm5, %vm3319_vm7  ;;  %v4758_v46 = vmov %v4750_v37  ;;  %v478_v31 = vadd.s32 3, %v347_v63  ;;  %v3457_v47 = vadd.s32 3, %v362_v53  ;;  %v3459_v21 = vadd.s32 3, %v363_v17 }
  0x9c   :  { %vm3453_vm14 = vcmp.lt.s32.totalorder %v4758_v46, %v2373_v12  ;;  %vm3468_vm5 = vcmp.lt.s32.totalorder %v397_v8, %v2373_v12  ;;  %vm3473_vm2 = vcmp.lt.s32.totalorder %v346_v7, %v2373_v12  ;;  %v379_v62 = vmul.u32 3, %v121_v58  ;;  %vm3477_vm15 = vmpackc.low %vm881_vm0, %vm880_vm4 }
  0x9d   :  { %v4765_v26 = vmov 0  ;;  %v3482_v54 = vadd.s32 3, %v378_v50  ;;  %v3485_v16 = vadd.s32 952, %v2362_v1  ;;  %v394_v14 = vmul.u32 3, %v136_v29  ;;  %2015 = vmatpush.bf16.msk.msrb.mxu1 %vm3477_vm15, %v4675_v3 }
  0x9e   :  { %v4766_v26 = vsel %vm3477_vm15, 4294967295, %v4765_v26  ;;  %vm4767_vm0 = vcmp.gt.s32.totalorder %v3287_v45, %v2366_v5  ;;  %vm3497_vm4 = vcmp.lt.s32.totalorder %v347_v63, %v2373_v12  ;;  %vm3502_vm10 = vcmp.lt.s32.totalorder %v362_v53, %v2373_v12  ;;  %v1309_v61 = vld.sshfl [vmem:[#allocation1 + $0x10] sm:$0xff pattern:$0x73625140] }
  0x9f   :  { %vm896_vm8 = vmand %vm4767_vm0, %vm3407_vm9  ;;  %v3507_v59 = vadd.s32 544, %v2362_v1  ;;  %vm4772_vm7 = vcmp.gt.s32.totalorder %v512_v55, %v2366_v5  ;;  %vm3519_vm15 = vcmp.lt.s32.totalorder %v363_v17, %v2373_v12  ;;  %v1310_v28 = vld.sshfl [vmem:[#allocation1 + $0x18] sm:$0xff pattern:$0x73625140]  ;;  %v4775_v7 = vmov 0 }
  0xa0   :  { %vm897_vm9 = vmand %vm4772_vm7, %vm3437_vm6  ;;  %v3527_v55 = vadd.s32 3, %v379_v62  ;;  %vm3530_vm6 = vcmp.lt.s32.totalorder %v378_v50, %v2373_v12  ;;  %v1324_v63 = vpack.c.bf16 %v1310_v28, %v1309_v61  ;;  %v3535_v53 = vadd.s32 552, %v2362_v1  ;;  %v1307_v17 = vld.sshfl [vmem:[#allocation1] sm:$0xff pattern:$0x73625140] }
  0xa1   :  { %vm3523_vm12 = vmpackc.low %vm897_vm9, %vm896_vm8  ;;  %vm4779_vm7 = vcmp.gt.s32.totalorder %v527_v22, %v2366_v5  ;;  %vm3547_vm3 = vcmp.lt.s32.totalorder %v379_v62, %v2373_v12  ;;  %v395_v49 = vmul.u32 3, %v3485_v16  ;;  %v3552_v56 = vadd.s32 3, %v394_v14  ;;  %v1308_v37 = vld.sshfl [vmem:[#allocation1 + $0x8] sm:$0xff pattern:$0x73625140] }
  0xa2   :  { %v4776_v7 = vsel %vm3523_vm12, 4294967295, %v4775_v7  ;;  %2031 = vmatpush.bf16.msk.msrb.mxu2 %vm3523_vm12, %v4675_v3  ;;  %vm912_vm8 = vmand %vm4779_vm7, %vm3453_vm14  ;;  %vm4782_vm13 = vcmp.gt.s32.totalorder %v528_v13, %v2366_v5  ;;  %vm3559_vm14 = vcmp.lt.s32.totalorder %v394_v14, %v2373_v12  ;;  %v1329_v58 = vunpack.c.l.bf16 %v1324_v63  ;;  %v1313_v43 = vld.sshfl [vmem:[#allocation1 + $0x30] sm:$0xff pattern:$0x73625140] }
  0xa3   :  { %vm913_vm0 = vmand %vm4782_vm13, %vm3468_vm5  ;;  %v1330_v50 = vunpack.c.h.bf16 %v1324_v63  ;;  %v1394_v29 = vunpack.c.l.b16 %v1324_v63  ;;  %v3564_v34 = vadd.s32 672, %v2362_v1  ;;  %v4785_v24 = vmov 0 }
  0xa4   :  { %vm3566_vm7 = vmpackc.low %vm913_vm0, %vm912_vm8  ;;  %v344_v46 = vmul.u32 3, %v3507_v59  ;;  %v3572_v13 = vadd.s32 680, %v2362_v1  ;;  %v1323_v19 = vpack.c.bf16 %v1308_v37, %v1307_v17  ;;  %v1395_v25 = vunpack.c.h.b16 %v1324_v63 }
  0xa5   :  { %v4786_v24 = vsel %vm3566_vm7, 4294967295, %v4785_v24  ;;  %2047 = vmatpush.bf16.msk.msrb.mxu3 %vm3566_vm7, %v4675_v3  ;;  %vm4788_vm5 = vcmp.gt.s32.totalorder %v477_v10, %v2366_v5  ;;  %v1344_v62 = vrot.slane %v1329_v58, 4  ;;  %v1345_v16 = vrot.slane %v1330_v50, 2 }
  0xa6   :  { %4787 = vst [vmem:[#allocation32_spill] sm:$0xff] %v4786_v24  ;;  %vm862_vm13 = vmand %vm4788_vm5, %vm3473_vm2  ;;  %v1402_v14 = vpack.c.b16 %v1394_v29, %v1394_v29  ;;  %v345_v61 = vmul.u32 3, %v3535_v53  ;;  %vm4789_vm0 = vcmp.gt.s32.totalorder %v478_v31, %v2366_v5  ;;  %v1327_v59 = vunpack.c.l.bf16 %v1323_v19 }
  0xa7   :  { %vm863_vm8 = vmand %vm4789_vm0, %vm3497_vm4  ;;  %v1328_v28 = vunpack.c.h.bf16 %v1323_v19  ;;  %v1392_v63 = vunpack.c.l.b16 %v1323_v19  ;;  %v1403_v17 = vpack.c.b16 %v1395_v25, %v1395_v25  ;;  %v4790_v37 = vmov 0 }
  0xa8   :  { %vm3586_vm9 = vmpackc.low %vm863_vm8, %vm862_vm13  ;;  %vm638_vm2 = vcmp.gt.s32.totalorder %v3527_v55, %v2366_v5  ;;  %v526_v10 = vadd.s32 3, %v395_v49  ;;  %1450 = vmatmul.bf16.vlgmr.msra.gmra.mxu2 %v1402_v14  ;;  %v1393_v4 = vunpack.c.h.b16 %v1323_v19  ;;  %vm4792_vm4 = vcmp.gt.s32.totalorder %v3457_v47, %v2366_v5 }
  0xa9   :  { %v4791_v37 = vsel %vm3586_vm9, 4294967295, %v4790_v37  ;;  %2001 = vmatpush.bf16.msk.msrb.mxu0 %vm3586_vm9, %v4675_v3  ;;  %vm878_vm13 = vmand %vm4792_vm4, %vm3502_vm10  ;;  %vm4793_vm0 = vcmask 1045508   ;;  %v118_v8 = vadd.s32 800, %v2362_v1  ;;  %v1343_v53 = vrot.slane %v1328_v28, 6  ;;  %1463 = vmatmul.bf16.vlgmr.msra.gmra.mxu3 %v1403_v17 }
  0xaa   :  { %v1350_v31 = vsel %vm4793_vm0, %v1344_v62, %v1345_v16  ;;  %v1400_v58 = vpack.c.b16 %v1392_v63, %v1392_v63  ;;  %vm4794_vm8 = vcmp.gt.s32.totalorder %v3459_v21, %v2366_v5  ;;  %v360_v50 = vmul.u32 3, %v3564_v34  ;;  %vm895_vm0 = vmand %vm638_vm2, %vm3547_vm3 }
  0xab   :  { %vm879_vm5 = vmand %vm4794_vm8, %vm3519_vm15  ;;  %v361_v39 = vmul.u32 3, %v3572_v13  ;;  %v119_v47 = vadd.s32 808, %v2362_v1  ;;  %v1401_v29 = vpack.c.b16 %v1393_v4, %v1393_v4  ;;  %v4795_v19 = vmov 0 }
  0xac   :  { %vm3612_vm10 = vmpackc.low %vm879_vm5, %vm878_vm13  ;;  %v475_v25 = vadd.s32 3, %v344_v46  ;;  %v476_v62 = vadd.s32 3, %v345_v61  ;;  %v3617_v16 = vadd.s32 928, %v2362_v1  ;;  %vm4798_vm4 = vcmask 1041408   ;;  %1424 = vmatmul.bf16.vlgmr.msra.gmra.mxu0 %v1400_v58 }
  0xad   :  { %v4796_v19 = vsel %vm3612_vm10, 4294967295, %v4795_v19  ;;  %v1349_v45 = vsel %vm4798_vm4, %v1327_v59, %v1343_v53  ;;  %2017 = vmatpush.bf16.msk.msrb.mxu1 %vm3612_vm10, %v4675_v3  ;;  %vm4799_vm15 = vcmp.gt.s32.totalorder %v3482_v54, %v2366_v5  ;;  %v135_v21 = vadd.s32 936, %v2362_v1 }
  0xae   :  { %4797 = vst [vmem:[#allocation33_spill] sm:$0xff] %v4796_v19  ;;  %vm894_vm5 = vmand %vm4799_vm15, %vm3530_vm6  ;;  %vm4800_vm13 = vcmask 1043456   ;;  %v3631_v13 = vadd.s32 528, %v2362_v1  ;;  %v3634_v14 = vadd.s32 536, %v2362_v1  ;;  %vm654_vm8 = vcmp.gt.s32.totalorder %v526_v10, %v2366_v5  ;;  %1437 = vmatmul.bf16.vlgmr.msra.gmra.mxu1 %v1401_v29 }
  0xaf   :  { %v1351_v34 = vsel %vm4800_vm13, %v1349_v45, %v1350_v31  ;;  %vm3643_vm6 = vcmp.lt.s32.totalorder %v395_v49, %v2373_v12  ;;  %v376_v0 = vmul.u32 3, %v118_v8  ;;  %vm3648_vm4 = vmpackc.low %vm895_vm0, %vm894_vm5  ;;  %v4803_v28 = vmov 0  ;;  %v1312_v31 = vld.sshfl [vmem:[#allocation1 + $0x28] sm:$0xff pattern:$0x73625140] }
  0xb0   :  { %v1357_v59 = vsub.f32 %v3386_v35, %v1351_v34  ;;  %v4804_v28 = vsel %vm3648_vm4, 4294967295, %v4803_v28  ;;  %vm3653_vm15 = vcmp.lt.s32.totalorder %v344_v46, %v2373_v12  ;;  %v491_v55 = vadd.s32 3, %v360_v50  ;;  %2033 = vmatpush.bf16.msk.msrb.mxu2 %vm3648_vm4, %v4675_v3  ;;  %vm911_vm0 = vmand %vm654_vm8, %vm3643_vm6 }
  0xb1   :  { %4805 = vst [vmem:[#allocation34_spill] sm:$0xff] %v4804_v28  ;;  %v377_v63 = vmul.u32 3, %v119_v47  ;;  %v3658_v49 = vadd.s32 656, %v2362_v1  ;;  %vm4808_vm3 = vcmp.gt.s32.totalorder %v3552_v56, %v2366_v5  ;;  %vm603_vm5 = vcmp.gt.s32.totalorder %v475_v25, %v2366_v5 }
  0xb2   :  { %vm910_vm2 = vmand %vm4808_vm3, %vm3559_vm14  ;;  %vm3670_vm13 = vcmp.lt.s32.totalorder %v345_v61, %v2373_v12  ;;  %v492_v46 = vadd.s32 3, %v361_v39  ;;  %v392_v17 = vmul.u32 3, %v3617_v16  ;;  %1361 = vst [vmem:[#allocation1] ss:$4 sm:$0xff] %v1357_v59  ;;  %vm604_vm4 = vcmp.gt.s32.totalorder %v476_v62, %v2366_v5 }
  0xb3   :  { %v393_v56 = vmul.u32 3, %v135_v21  ;;  %v342_v22 = vmul.u32 3, %v3631_v13  ;;  %v343_v4 = vmul.u32 3, %v3634_v14  ;;  %vm3682_vm14 = vmpackc.low %vm911_vm0, %vm910_vm2  ;;  %v4811_v61 = vmov 0 }
  0xb4   :  { %v4812_v61 = vsel %vm3682_vm14, 4294967295, %v4811_v61  ;;  %vm3687_vm3 = vcmp.lt.s32.totalorder %v360_v50, %v2373_v12  ;;  %v507_v8 = vadd.s32 3, %v376_v0  ;;  %2049 = vmatpush.bf16.msk.msrb.mxu3 %vm3682_vm14, %v4675_v3  ;;  %vm860_vm8 = vmand %vm603_vm5, %vm3653_vm15  ;;  %vm619_vm6 = vcmp.gt.s32.totalorder %v491_v55, %v2366_v5  ;;  %v1314_v55 = vld.sshfl [vmem:[#allocation1 + $0x38] sm:$0xff pattern:$0x73625140] }
  0xb5   :  { %4813 = vst [vmem:[#allocation35_spill] sm:$0xff] %v4812_v61  ;;  %v508_v10 = vadd.s32 3, %v377_v63  ;;  %v101_v53 = vadd.s32 664, %v2362_v1  ;;  %v358_v58 = vmul.u32 3, %v3658_v49  ;;  %vm861_vm2 = vmand %vm604_vm4, %vm3670_vm13  ;;  %vm620_vm0 = vcmp.gt.s32.totalorder %v492_v46, %v2366_v5 }
  0xb6   :  { %vm749_vm7 = vcmp.lt.s32.totalorder %v361_v39, %v2373_v12  ;;  %v523_v50 = vadd.s32 3, %v392_v17  ;;  %vm3703_vm10 = vmpackc.low %vm861_vm2, %vm860_vm8  ;;  %v4816_v47 = vmov 0  ;;  %vm3708_vm15 = vcmp.lt.s32.totalorder %v376_v0, %v2373_v12  ;;  %v1311_v49 = vld.sshfl [vmem:[#allocation1 + $0x20] sm:$0xff pattern:$0x73625140] }
  0xb7   :  { %v4817_v47 = vsel %vm3703_vm10, 4294967295, %v4816_v47  ;;  %v524_v25 = vadd.s32 3, %v393_v56  ;;  %v473_v62 = vadd.s32 3, %v342_v22  ;;  %v474_v16 = vadd.s32 3, %v343_v4  ;;  %2003 = vmatpush.bf16.msk.msrb.mxu0 %vm3703_vm10, %v4675_v3  ;;  %vm876_vm4 = vmand %vm619_vm6, %vm3687_vm3 }
  0xb8   :  { %4818 = vst [vmem:[#allocation36_spill] sm:$0xff] %v4817_v47  ;;  %vm3719_vm13 = vcmp.lt.s32.totalorder %v377_v63, %v2373_v12  ;;  %v116_v45 = vadd.s32 784, %v2362_v1  ;;  %v117_v21 = vadd.s32 792, %v2362_v1  ;;  %vm877_vm8 = vmand %vm620_vm0, %vm749_vm7  ;;  %v359_v34 = vmul.u32 3, %v101_v53 }
  0xb9   :  { %v489_v13 = vadd.s32 3, %v358_v58  ;;  %v3727_v14 = vadd.s32 912, %v2362_v1  ;;  %vm3729_vm3 = vmpackc.low %vm877_vm8, %vm876_vm4  ;;  %v4823_v54 = vmov 0  ;;  %vm3735_vm5 = vcmp.lt.s32.totalorder %v392_v17, %v2373_v12 }
  0xba   :  { %v4824_v54 = vsel %vm3729_vm3, 4294967295, %v4823_v54  ;;  %vm3740_vm7 = vcmp.lt.s32.totalorder %v393_v56, %v2373_v12  ;;  %2019 = vmatpush.bf16.msk.msrb.mxu1 %vm3729_vm3, %v4675_v3  ;;  %vm4830_vm0 = vcmp.gt.s32.totalorder %v507_v8, %v2366_v5  ;;  %vm652_vm8 = vcmp.gt.s32.totalorder %v524_v25, %v2366_v5 }
  0xbb   :  { %4825 = vst [vmem:[#allocation37_spill] sm:$0xff] %v4824_v54  ;;  %vm892_vm4 = vmand %vm4830_vm0, %vm3708_vm15  ;;  %v3755_v63 = vadd.s32 920, %v2362_v1  ;;  %vm4831_vm14 = vcmp.gt.s32.totalorder %v508_v10, %v2366_v5  ;;  %vm3762_vm10 = vcmp.lt.s32.totalorder %v342_v22, %v2373_v12  ;;  %vm3767_vm15 = vcmp.lt.s32.totalorder %v343_v4, %v2373_v12 }
  0xbc   :  { %vm893_vm3 = vmand %vm4831_vm14, %vm3719_vm13  ;;  %v374_v17 = vmul.u32 3, %v116_v45  ;;  %v375_v56 = vmul.u32 3, %v117_v21  ;;  %v4836_v8 = vmov 0  ;;  %v490_v53 = vadd.s32 3, %v359_v34 }
  0xbd   :  { %vm3771_vm0 = vmpackc.low %vm893_vm3, %vm892_vm4  ;;  %vm3776_vm14 = vcmp.lt.s32.totalorder %v358_v58, %v2373_v12  ;;  %v390_v22 = vmul.u32 3, %v3727_v14  ;;  %v3781_v29 = vpack.c.bf16 %v1314_v55, %v1313_v43  ;;  %vm4841_vm13 = vcmp.gt.s32.totalorder %v523_v50, %v2366_v5 }
  0xbe   :  { %v4837_v8 = vsel %vm3771_vm0, 4294967295, %v4836_v8  ;;  %2035 = vmatpush.bf16.msk.msrb.mxu2 %vm3771_vm0, %v4675_v3  ;;  %vm908_vm3 = vmand %vm4841_vm13, %vm3735_vm5  ;;  %vm3792_vm2 = vcmp.lt.s32.totalorder %v359_v34, %v2373_v12  ;;  %v82_v58 = vadd.s32 512, %v2362_v1  ;;  %v3797_v39 = vpack.c.bf16 %v1312_v31, %v1311_v49 }
  0xbf   :  { %4838 = vst [vmem:[#allocation38_spill] sm:$0xff] %v4837_v8  ;;  %vm909_vm6 = vmand %vm652_vm8, %vm3740_vm7  ;;  %v391_v45 = vmul.u32 3, %v3755_v63  ;;  %v83_v50 = vadd.s32 520, %v2362_v1  ;;  %v1333_v21 = vunpack.c.l.bf16 %v3781_v29  ;;  %v1334_v34 = vunpack.c.h.bf16 %v3781_v29 }
  0xc0   :  { %vm3807_vm5 = vmpackc.low %vm909_vm6, %vm908_vm3  ;;  %v4844_v14 = vmov 0  ;;  %v505_v0 = vadd.s32 3, %v374_v17  ;;  %v506_v43 = vadd.s32 3, %v375_v56  ;;  %v1331_v55 = vunpack.c.l.bf16 %v3797_v39 }
  0xc1   :  { %v4845_v14 = vsel %vm3807_vm5, 4294967295, %v4844_v14  ;;  %v1332_v59 = vunpack.c.h.bf16 %v3797_v39  ;;  %2051 = vmatpush.bf16.msk.msrb.mxu3 %vm3807_vm5, %v4675_v3  ;;  %vm4847_vm7 = vcmp.gt.s32.totalorder %v473_v62, %v2366_v5  ;;  %vm3821_vm6 = vcmp.lt.s32.totalorder %v374_v17, %v2373_v12 }
  0xc2   :  { %4846 = vst [vmem:[#allocation39_spill] sm:$0xff] %v4845_v14  ;;  %vm858_vm8 = vmand %vm4847_vm7, %vm3762_vm10  ;;  %v98_v63 = vadd.s32 640, %v2362_v1  ;;  %v1347_v49 = vrot.slane %v1333_v21, 4  ;;  %v1348_v31 = vrot.slane %v1334_v34, 2  ;;  %vm4850_vm13 = vcmp.gt.s32.totalorder %v474_v16, %v2366_v5 }
  0xc3   :  { %vm859_vm3 = vmand %vm4850_vm13, %vm3767_vm15  ;;  %vm618_vm4 = vcmp.gt.s32.totalorder %v490_v53, %v2366_v5  ;;  %v340_v35 = vmul.u32 3, %v82_v58  ;;  %v99_v62 = vadd.s32 648, %v2362_v1  ;;  %v1346_v14 = vrot.slane %v1332_v59, 6 }
  0xc4   :  { %vm3832_vm10 = vmpackc.low %vm859_vm3, %vm858_vm8  ;;  %v4851_v17 = vmov 0  ;;  %vm3837_vm7 = vcmp.lt.s32.totalorder %v375_v56, %v2373_v12  ;;  %v521_v21 = vadd.s32 3, %v390_v22  ;;  %v341_v46 = vmul.u32 3, %v83_v50 }
  0xc5   :  { %v4852_v17 = vsel %vm3832_vm10, 4294967295, %v4851_v17  ;;  %vm4855_vm5 = vcmask 1045508   ;;  %2005 = vmatpush.bf16.msk.msrb.mxu0 %vm3832_vm10, %v4675_v3  ;;  %vm4856_vm15 = vcmp.gt.s32.totalorder %v489_v13, %v2366_v5  ;;  %vm633_vm13 = vcmp.gt.s32.totalorder %v505_v0, %v2366_v5 }
  0xc6   :  { %v1353_v16 = vsel %vm4855_vm5, %v1347_v49, %v1348_v31  ;;  %vm874_vm8 = vmand %vm4856_vm15, %vm3776_vm14  ;;  %v522_v58 = vadd.s32 3, %v391_v45  ;;  %v114_v56 = vadd.s32 768, %v2362_v1  ;;  %vm4857_vm3 = vcmask 1041408  }
  0xc7   :  { %v1352_v34 = vsel %vm4857_vm3, %v1331_v55, %v1346_v14  ;;  %vm875_vm5 = vmand %vm618_vm4, %vm3792_vm2  ;;  %vm634_vm0 = vcmp.gt.s32.totalorder %v506_v43, %v2366_v5  ;;  %v356_v50 = vmul.u32 3, %v98_v63  ;;  %v115_v10 = vadd.s32 776, %v2362_v1 }
  0xc8   :  { %vm4858_vm10 = vcmask 1043456   ;;  %vm3859_vm14 = vmpackc.low %vm875_vm5, %vm874_vm8  ;;  %v4859_v59 = vmov 0  ;;  %v471_v0 = vadd.s32 3, %v340_v35  ;;  %v357_v49 = vmul.u32 3, %v99_v62 }
  0xc9   :  { %v1354_v13 = vsel %vm4858_vm10, %v1352_v34, %v1353_v16  ;;  %v4860_v59 = vsel %vm3859_vm14, 4294967295, %v4859_v59  ;;  %2021 = vmatpush.bf16.msk.msrb.mxu1 %vm3859_vm14, %v4675_v3  ;;  %vm890_vm2 = vmand %vm633_vm13, %vm3821_vm6  ;;  %vm649_vm4 = vcmp.gt.s32.totalorder %v521_v21, %v2366_v5  ;;  %vm778_vm15 = vcmp.lt.s32.totalorder %v390_v22, %v2373_v12 }
  0xca   :  { %v1358_v14 = vsub.f32 %v3415_v40, %v1354_v13  ;;  %v472_v53 = vadd.s32 3, %v341_v46  ;;  %v130_v4 = vadd.s32 896, %v2362_v1  ;;  %vm891_vm10 = vmand %vm634_vm0, %vm3837_vm7  ;;  %vm650_vm8 = vcmp.gt.s32.totalorder %v522_v58, %v2366_v5 }
  0xcb   :  { %vm779_vm3 = vcmp.lt.s32.totalorder %v391_v45, %v2373_v12  ;;  %v372_v40 = vmul.u32 3, %v114_v56  ;;  %v131_v43 = vadd.s32 904, %v2362_v1  ;;  %vm3877_vm5 = vmpackc.low %vm891_vm10, %vm890_vm2  ;;  %v4861_v55 = vmov 0 }
  0xcc   :  { %1363 = vst [vmem:[#allocation1 + $0x20] ss:$4 sm:$0xff] %v1358_v14  ;;  %v4862_v55 = vsel %vm3877_vm5, 4294967295, %v4861_v55  ;;  %v487_v25 = vadd.s32 3, %v356_v50  ;;  %v373_v22 = vmul.u32 3, %v115_v10  ;;  %2037 = vmatpush.bf16.msk.msrb.mxu2 %vm3877_vm5, %v4675_v3  ;;  %vm906_vm6 = vmand %vm649_vm4, %vm778_vm15  ;;  %vm599_vm0 = vcmp.gt.s32.totalorder %v471_v0, %v2366_v5  ;;  %v4895_v14 = vld [vmem:[#allocation26_spill] sm:$0xff] }
  0xcd   :  { %vm728_vm7 = vcmp.lt.s32.totalorder %v340_v35, %v2373_v12  ;;  %v488_v8 = vadd.s32 3, %v357_v49  ;;  %vm907_vm13 = vmand %vm650_vm8, %vm779_vm3  ;;  %vm600_vm14 = vcmp.gt.s32.totalorder %v472_v53, %v2366_v5  ;;  %vm729_vm2 = vcmp.lt.s32.totalorder %v341_v46, %v2373_v12 }
  0xce   :  { %v388_v1 = vmul.u32 3, %v130_v4  ;;  %v1396_v45 = vunpack.c.l.b16 %v3797_v39  ;;  %vm3889_vm10 = vmpackc.low %vm907_vm13, %vm906_vm6  ;;  %v4863_v63 = vmov 0  ;;  %v503_v31 = vadd.s32 3, %v372_v40  ;;  %v4896_v4 = vld [vmem:[#allocation6_spill] sm:$0xff] }
  0xcf   :  { %v4864_v63 = vsel %vm3889_vm10, 4294967295, %v4863_v63  ;;  %v389_v62 = vmul.u32 3, %v131_v43  ;;  %2053 = vmatpush.bf16.msk.msrb.mxu3 %vm3889_vm10, %v4675_v3  ;;  %vm856_vm4 = vmand %vm599_vm0, %vm728_vm7  ;;  %vm615_vm15 = vcmp.gt.s32.totalorder %v487_v25, %v2366_v5  ;;  %vm744_vm8 = vcmp.lt.s32.totalorder %v356_v50, %v2373_v12  ;;  %v4900_v43 = vld [vmem:[#allocation8_spill] sm:$0xff] }
  0xd0   :  { %v504_v35 = vadd.s32 3, %v373_v22  ;;  %vm857_vm3 = vmand %vm600_vm14, %vm729_vm2  ;;  %vm616_vm5 = vcmp.gt.s32.totalorder %v488_v8, %v2366_v5  ;;  %vm745_vm6 = vcmp.lt.s32.totalorder %v357_v49, %v2373_v12  ;;  %v1397_v21 = vunpack.c.h.b16 %v3797_v39  ;;  %v4893_v49 = vld [vmem:[#allocation7_spill] sm:$0xff] }
  0xd1   :  { %vm3901_vm13 = vmpackc.low %vm857_vm3, %vm856_vm4  ;;  %v4865_v46 = vmov 0  ;;  %v519_v16 = vadd.s32 3, %v388_v1  ;;  %v1404_v58 = vpack.c.b16 %v1396_v45, %v1396_v45  ;;  %vm631_vm7 = vcmp.gt.s32.totalorder %v503_v31, %v2366_v5  ;;  %v4906_v45 = vld [vmem:[#allocation14_spill] sm:$0xff]  ;;  %v4908_v31 = vld [vmem:[#allocation27_spill] sm:$0xff] }
  0xd2   :  { %v4866_v46 = vsel %vm3901_vm13, 4294967295, %v4865_v46  ;;  %2007 = vmatpush.bf16.msk.msrb.mxu0 %vm3901_vm13, %v4675_v3  ;;  %vm872_vm0 = vmand %vm615_vm15, %vm744_vm8  ;;  %vm760_vm14 = vcmp.lt.s32.totalorder %v372_v40, %v2373_v12  ;;  %v520_v56 = vadd.s32 3, %v389_v62  ;;  %vm632_vm10 = vcmp.gt.s32.totalorder %v504_v35, %v2366_v5  ;;  %v4898_v40 = vld [vmem:[#allocation10_spill] sm:$0xff]  ;;  %v4909_v35 = vld [vmem:[#allocation12_spill] sm:$0xff] }
  0xd3   :  { %vm873_vm2 = vmand %vm616_vm5, %vm745_vm6  ;;  %vm761_vm4 = vcmp.lt.s32.totalorder %v373_v22, %v2373_v12  ;;  %v1398_v39 = vunpack.c.l.b16 %v3781_v29  ;;  %v1405_v50 = vpack.c.b16 %v1397_v21, %v1397_v21  ;;  %vm647_vm15 = vcmp.gt.s32.totalorder %v519_v16, %v2366_v5  ;;  %v4902_v22 = vld [vmem:[#allocation11_spill] sm:$0xff]  ;;  %v4911_v21 = vld [vmem:[#allocation18_spill] sm:$0xff] }
  0xd4   :  { %vm3916_vm3 = vmpackc.low %vm873_vm2, %vm872_vm0  ;;  %vm776_vm8 = vcmp.lt.s32.totalorder %v388_v1, %v2373_v12  ;;  %vm777_vm13 = vcmp.lt.s32.totalorder %v389_v62, %v2373_v12  ;;  %vm4869_vm0 = vnez %v4539_v42  ;;  %v1399_v10 = vunpack.c.h.b16 %v3781_v29  ;;  %v4891_v29 = vld [vmem:[#allocation5_spill] sm:$0xff]  ;;  %v1364_v42 = vld.sshfl [vmem:[#allocation1] sm:$0xff pattern:$0x73625140] }
  0xd5   :  { %2023 = vmatpush.bf16.msk.msrb.mxu1 %vm3916_vm3, %v4675_v3  ;;  %vm888_vm5 = vmand %vm631_vm7, %vm760_vm14  ;;  %1476 = vmatmul.bf16.vlgmr.msrb.gmra.mxu0 %v1404_v58  ;;  %vm4872_vm7 = vnez %v4547_v2  ;;  %v1406_v0 = vpack.c.b16 %v1398_v39, %v1398_v39  ;;  %v1524_v53 = vunpack.c.l.b16 %v4895_v14  ;;  %v1525_v25 = vunpack.c.h.b16 %v4895_v14  ;;  %v4904_v1 = vld [vmem:[#allocation9_spill] sm:$0xff]  ;;  %v4913_v58 = vld [vmem:[#allocation15_spill] sm:$0xff] }
  0xd6   :  { %2057 = vmatpush.bf16.msk.msra.mxu0 %vm2398_vm11, %v4675_v3  ;;  %vm889_vm6 = vmand %vm632_vm10, %vm761_vm4  ;;  %vm648_vm11 = vcmp.gt.s32.totalorder %v520_v56, %v2366_v5  ;;  %vm4873_vm4 = vnez %v4541_v48  ;;  %v4874_v5 = vmov 0  ;;  %v1407_v12 = vpack.c.b16 %v1399_v10, %v1399_v10  ;;  %v4915_v56 = vld [vmem:[#allocation19_spill] sm:$0xff]  ;;  %v4923_v14 = vld [vmem:[#allocation22_spill] sm:$0xff] }
  0xd7   :  { %vm3931_vm2 = vmpackc.low %vm889_vm6, %vm888_vm5  ;;  %vm4876_vm6 = vnez %v4549_v11  ;;  %v1532_v8 = vpack.c.b16 %v1524_v53, %v1524_v53  ;;  %v1526_v62 = vunpack.c.l.b16 %v4908_v31  ;;  %v1533_v16 = vpack.c.b16 %v1525_v25, %v1525_v25  ;;  %v4925_v25 = vld [vmem:[#allocation23_spill] sm:$0xff]  ;;  %v1365_v48 = vld.sshfl [vmem:[#allocation1 + $0x8] sm:$0xff pattern:$0x73625140] }
  0xd8   :  { %2039 = vmatpush.bf16.msk.msrb.mxu2 %vm3931_vm2, %v4675_v3  ;;  %vm904_vm10 = vmand %vm647_vm15, %vm776_vm8  ;;  %1489 = vmatmul.bf16.vlgmr.msrb.gmra.mxu1 %v1405_v50  ;;  %vm4879_vm15 = vnez %v4553_v20  ;;  %vm4880_vm8 = vnez %v4559_v44  ;;  %v1527_v39 = vunpack.c.h.b16 %v4908_v31  ;;  %v4917_v50 = vld [vmem:[#allocation13_spill] sm:$0xff]  ;;  %v1381_v11 = vpack.c.bf16 %v1365_v48, %v1365_v48 }
  0xd9   :  { %2073 = vmatpush.bf16.msk.msra.mxu1 %vm4869_vm0, %v4675_v3  ;;  %vm905_vm14 = vmand %vm648_vm11, %vm777_vm13  ;;  %vm4877_vm11 = vnez %v4545_v57  ;;  %vm4878_vm13 = vnez %v4557_v36  ;;  %v1534_v10 = vpack.c.b16 %v1526_v62, %v1526_v62  ;;  %v4929_v31 = vld [vmem:[#allocation21_spill] sm:$0xff]  ;;  %v4931_v62 = vld [vmem:[#allocation24_spill] sm:$0xff] }
  0xda   :  { %2059 = vmatpush.bf16.msk.msra.mxu0 %vm4872_vm7, %v4675_v3  ;;  %vm3944_vm5 = vmpackc.low %vm905_vm14, %vm904_vm10  ;;  %vm4881_vm10 = vnez %v4555_v27  ;;  %vm4882_vm14 = vnez %v4565_v6  ;;  %v1535_v53 = vpack.c.b16 %v1527_v39, %v1527_v39  ;;  %v4935_v39 = vld [vmem:[#allocation31_spill] sm:$0xff]  ;;  %v1366_v2 = vld.sshfl [vmem:[#allocation1 + $0x10] sm:$0xff pattern:$0x73625140] }
  0xdb   :  { %v4875_v5 = vsel %vm3944_vm5, 4294967295, %v4874_v5  ;;  %2055 = vmatpush.bf16.msk.msrb.mxu3 %vm3944_vm5, %v4675_v3  ;;  %1502 = vmatmul.bf16.vlgmr.msrb.gmra.mxu2 %v1406_v0  ;;  %v4919_v0 = vld [vmem:[#allocation16_spill] sm:$0xff] }
  0xdc   :  { %2089 = vmatpush.bf16.msk.msra.mxu2 %vm4873_vm4, %v4675_v3 }
  0xdd   :  { %2075 = vmatpush.bf16.msk.msra.mxu1 %vm4876_vm6, %v4675_v3 }
  0xde   :  { %2061 = vmatpush.bf16.msk.msra.mxu0 %vm4878_vm13, %v4675_v3  ;;  %1515 = vmatmul.bf16.vlgmr.msrb.gmra.mxu3 %v1407_v12  ;;  %vm4883_vm13 = vnez %v4561_v52  ;;  %v4921_v12 = vld [vmem:[#allocation20_spill] sm:$0xff] }
  0xdf   :  { %2105 = vmatpush.bf16.msk.msra.mxu3 %vm4877_vm11, %v4675_v3  ;;  %vm4885_vm11 = vnez %v4563_v60 }
  0xe0   :  { %2091 = vmatpush.bf16.msk.msra.mxu2 %vm4879_vm15, %v4675_v3  ;;  %vm4884_vm15 = vnez %v4567_v15 }
  0xe1   :  { %2077 = vmatpush.bf16.msk.msra.mxu1 %vm4880_vm8, %v4675_v3  ;;  %vm4886_vm8 = vnez %v4573_v41 }
  0xe2   :  { %2063 = vmatpush.bf16.msk.msra.mxu0 %vm4882_vm14, %v4675_v3  ;;  %vm4888_vm14 = vnez %v4575_v51 }
  0xe3   :  { %2107 = vmatpush.bf16.msk.msra.mxu3 %vm4881_vm10, %v4675_v3  ;;  %vm4887_vm10 = vnez %v4569_v23 }
  0xe4   :  { %2093 = vmatpush.bf16.msk.msra.mxu2 %vm4883_vm13, %v4675_v3  ;;  %vm4889_vm13 = vnez %v4571_v32 }
  0xe5   :  { %2079 = vmatpush.bf16.msk.msra.mxu1 %vm4884_vm15, %v4675_v3  ;;  %vm4890_vm15 = vnez %v4583_v18 }
  0xe6   :  { %2065 = vmatpush.bf16.msk.msra.mxu0 %vm4886_vm8, %v4675_v3  ;;  %vm4894_vm8 = vnez %v4893_v49 }
  0xe7   :  { %2109 = vmatpush.bf16.msk.msra.mxu3 %vm4885_vm11, %v4675_v3  ;;  %vm4892_vm11 = vnez %v4891_v29 }
  0xe8   :  { %2095 = vmatpush.bf16.msk.msra.mxu2 %vm4887_vm10, %v4675_v3 }
  0xe9   :  { %2081 = vmatpush.bf16.msk.msra.mxu1 %vm4888_vm14, %v4675_v3  ;;  %vm4897_vm14 = vnez %v4896_v4 }
  0xea   :  { %2067 = vmatpush.bf16.msk.msra.mxu0 %vm4890_vm15, %v4675_v3  ;;  %vm4901_vm15 = vnez %v4900_v43 }
  0xeb   :  { %2111 = vmatpush.bf16.msk.msra.mxu3 %vm4889_vm13, %v4675_v3  ;;  %vm4899_vm13 = vnez %v4898_v40 }
  0xec   :  { %2097 = vmatpush.bf16.msk.msra.mxu2 %vm4892_vm11, %v4675_v3  ;;  %vm4903_vm11 = vnez %v4902_v22 }
  0xed   :  { %2083 = vmatpush.bf16.msk.msra.mxu1 %vm4894_vm8, %v4675_v3  ;;  %vm4905_vm8 = vnez %v4904_v1 }
  0xee   :  { %2069 = vmatpush.bf16.msk.msra.mxu0 %vm4899_vm13, %v4675_v3  ;;  %vm4910_vm13 = vnez %v4909_v35 }
  0xef   :  { %2113 = vmatpush.bf16.msk.msra.mxu3 %vm4897_vm14, %v4675_v3  ;;  %vm4907_vm14 = vnez %v4906_v45 }
  0xf0   :  { %2099 = vmatpush.bf16.msk.msra.mxu2 %vm4901_vm15, %v4675_v3  ;;  %vm4912_vm15 = vnez %v4911_v21 }
  0xf1   :  { %2085 = vmatpush.bf16.msk.msra.mxu1 %vm4903_vm11, %v4675_v3  ;;  %vm4914_vm11 = vnez %v4913_v58 }
  0xf2   :  { %2071 = vmatpush.bf16.msk.msra.mxu0 %vm4907_vm14, %v4675_v3  ;;  %vm4918_vm14 = vnez %v4917_v50 }
  0xf3   :  { %2115 = vmatpush.bf16.msk.msra.mxu3 %vm4905_vm8, %v4675_v3  ;;  %vm4916_vm8 = vnez %v4915_v56 }
  0xf4   :  { %2101 = vmatpush.bf16.msk.msra.mxu2 %vm4910_vm13, %v4675_v3  ;;  %vm4926_vm13 = vnez %v4925_v25 }
  0xf5   :  { %2087 = vmatpush.bf16.msk.msra.mxu1 %vm4914_vm11, %v4675_v3  ;;  %1556 = vmatmul.bf16.vlgmr.msra.gmra.mxu0 %v1532_v8  ;;  %vm4922_vm11 = vnez %v4921_v12  ;;  %v4927_v8 = vld [vmem:[#allocation17_spill] sm:$0xff] }
  0xf6   :  { %2121 = vmatpush.bf16.msk.msrb.mxu0 %vm4912_vm15, %v4675_v3  ;;  %vm4920_vm15 = vnez %v4919_v0 }
  0xf7   :  { %2117 = vmatpush.bf16.msk.msra.mxu3 %vm4918_vm14, %v4675_v3  ;;  %vm4928_vm14 = vnez %v4927_v8  ;;  %v4937_v8 = vld [vmem:[#allocation25_spill] sm:$0xff] }
  0xf8   :  { %2103 = vmatpush.bf16.msk.msra.mxu2 %vm4920_vm15, %v4675_v3  ;;  %1569 = vmatmul.bf16.vlgmr.msra.gmra.mxu1 %v1533_v16  ;;  %vm4930_vm15 = vnez %v4929_v31  ;;  %v4933_v16 = vld [vmem:[#allocation29_spill] sm:$0xff] }
  0xf9   :  { %2137 = vmatpush.bf16.msk.msrb.mxu1 %vm4916_vm8, %v4675_v3  ;;  %vm4924_vm8 = vnez %v4923_v14 }
  0xfa   :  { %2123 = vmatpush.bf16.msk.msrb.mxu0 %vm4924_vm8, %v4675_v3  ;;  %vm4934_vm8 = vnez %v4933_v16 }
  0xfb   :  { %2119 = vmatpush.bf16.msk.msra.mxu3 %vm4928_vm14, %v4675_v3  ;;  %1582 = vmatmul.bf16.vlgmr.msra.gmra.mxu2 %v1534_v10  ;;  %vm4938_vm14 = vnez %v4937_v8  ;;  %v4948_v10 = vld [vmem:[#allocation28_spill] sm:$0xff] }
  0xfc   :  { %2153 = vmatpush.bf16.msk.msrb.mxu2 %vm4922_vm11, %v4675_v3  ;;  %vm4932_vm11 = vnez %v4931_v62 }
  0xfd   :  { %2139 = vmatpush.bf16.msk.msrb.mxu1 %vm4926_vm13, %v4675_v3  ;;  %vm4936_vm13 = vnez %v4935_v39 }
  0xfe   :  { %2125 = vmatpush.bf16.msk.msrb.mxu0 %vm4934_vm8, %v4675_v3  ;;  %1595 = vmatmul.bf16.vlgmr.msra.gmra.mxu3 %v1535_v53  ;;  %vm4940_vm8 = vnez %v4766_v26  ;;  %v1528_v53 = vunpack.c.l.b16 %v4948_v10 }
  0xff   :  { %2169 = vmatpush.bf16.msk.msrb.mxu3 %vm4930_vm15, %v4675_v3  ;;  %vm4941_vm15 = vnez %v4745_v9 }
 0x100   :  { %2155 = vmatpush.bf16.msk.msrb.mxu2 %vm4932_vm11, %v4675_v3  ;;  %vm4939_vm11 = vnez %v4753_v33 }
 0x101   :  { %2141 = vmatpush.bf16.msk.msrb.mxu1 %vm4936_vm13, %v4675_v3 }
 0x102   :  { %2127 = vmatpush.bf16.msk.msrb.mxu0 %vm4939_vm11, %v4675_v3  ;;  %vm4943_vm11 = vnez %v4786_v24  ;;  %v4949_v24 = vld [vmem:[#allocation38_spill] sm:$0xff] }
 0x103   :  { %2171 = vmatpush.bf16.msk.msrb.mxu3 %vm4938_vm14, %v4675_v3 }
 0x104   :  { %2157 = vmatpush.bf16.msk.msrb.mxu2 %vm3356_vm1, %v4675_v3  ;;  %vm4942_vm1 = vnez %v4796_v19 }
 0x105   :  { %2143 = vmatpush.bf16.msk.msrb.mxu1 %vm4940_vm8, %v4675_v3  ;;  %vm4944_vm8 = vnez %v4804_v28  ;;  %v4955_v28 = vld [vmem:[#allocation30_spill] sm:$0xff] }
 0x106   :  { %2129 = vmatpush.bf16.msk.msrb.mxu0 %vm3586_vm9, %v4675_v3  ;;  %vm4947_vm9 = vnez %v4812_v61  ;;  %v1536_v61 = vpack.c.b16 %v1528_v53, %v1528_v53  ;;  %v1530_v19 = vunpack.c.l.b16 %v4955_v28  ;;  %v1531_v53 = vunpack.c.h.b16 %v4955_v28 }
 0x107   :  { %2173 = vmatpush.bf16.msk.msrb.mxu3 %vm4941_vm15, %v4675_v3  ;;  %vm4945_vm15 = vnez %v4817_v47  ;;  %v1529_v47 = vunpack.c.h.b16 %v4948_v10 }
 0x108   :  { %2159 = vmatpush.bf16.msk.msrb.mxu2 %vm3523_vm12, %v4675_v3  ;;  %vm4946_vm12 = vnez %v4824_v54  ;;  %v4953_v54 = vld [vmem:[#allocation39_spill] sm:$0xff] }
 0x109   :  { %2145 = vmatpush.bf16.msk.msrb.mxu1 %vm4942_vm1, %v4675_v3  ;;  %v1537_v10 = vpack.c.b16 %v1529_v47, %v1529_v47  ;;  %v1538_v47 = vpack.c.b16 %v1530_v19, %v1530_v19 }
 0x10a   :  { %2131 = vmatpush.bf16.msk.msrb.mxu0 %vm4945_vm15, %v4675_v3  ;;  %vm4952_vm15 = vnez %v4860_v59 }
 0x10b   :  { %2175 = vmatpush.bf16.msk.msrb.mxu3 %vm4943_vm11, %v4675_v3  ;;  %vm4950_vm11 = vnez %v4949_v24 }
 0x10c   :  { %2161 = vmatpush.bf16.msk.msrb.mxu2 %vm4944_vm8, %v4675_v3  ;;  %vm4951_vm8 = vnez %v4852_v17 }
 0x10d   :  { %2147 = vmatpush.bf16.msk.msrb.mxu1 %vm4946_vm12, %v4675_v3  ;;  %vm4954_vm12 = vnez %v4953_v54 }
 0x10e   :  { %2133 = vmatpush.bf16.msk.msrb.mxu0 %vm4951_vm8, %v4675_v3  ;;  %vm4957_vm8 = vnez %v4866_v46 }
 0x10f   :  { %2177 = vmatpush.bf16.msk.msrb.mxu3 %vm4947_vm9, %v4675_v3 }
 0x110   :  { %2163 = vmatpush.bf16.msk.msrb.mxu2 %vm4950_vm11, %v4675_v3  ;;  %vm4956_vm11 = vnez %v4862_v55 }
 0x111   :  { %2149 = vmatpush.bf16.msk.msrb.mxu1 %vm4952_vm15, %v4675_v3  ;;  %vm4958_vm15 = vnez %v4535_v30  ;;  %v1539_v30 = vpack.c.b16 %v1531_v53, %v1531_v53 }
 0x112   :  { %2135 = vmatpush.bf16.msk.msrb.mxu0 %vm4957_vm8, %v4675_v3 }
 0x113   :  { %2179 = vmatpush.bf16.msk.msrb.mxu3 %vm4954_vm12, %v4675_v3 }
 0x114   :  { %2165 = vmatpush.bf16.msk.msrb.mxu2 %vm4956_vm11, %v4675_v3  ;;  %vm4959_vm11 = vnez %v4864_v63 }
 0x115   :  { %2151 = vmatpush.bf16.msk.msrb.mxu1 %vm3916_vm3, %v4675_v3  ;;  %1608 = vmatmul.bf16.vlgmr.msrb.gmra.mxu0 %v1536_v61  ;;  %v1368_v61 = vld.sshfl [vmem:[#allocation1 + $0x20] sm:$0xff pattern:$0x73625140] }
 0x116   :  { %2185 = vmatpush.bf16.msk.msra.mxu0 %vm4958_vm15, %v4675_v3  ;;  %vm4964_vm15 = vnez %v4555_v27  ;;  %v1367_v27 = vld.sshfl [vmem:[#allocation1 + $0x18] sm:$0xff pattern:$0x73625140] }
 0x117   :  { %2181 = vmatpush.bf16.msk.msrb.mxu3 %vm4959_vm11, %v4675_v3 }
 0x118   :  { %2167 = vmatpush.bf16.msk.msrb.mxu2 %vm3931_vm2, %v4675_v3  ;;  %1621 = vmatmul.bf16.vlgmr.msrb.gmra.mxu1 %v1537_v10 }
 0x119   :  { %2201 = vmatpush.bf16.msk.msra.mxu1 %vm4869_vm0, %v4675_v3  ;;  %vm4960_vm0 = vnez %v4545_v57  ;;  %v1380_v57 = vpack.c.bf16 %v1364_v42, %v1364_v42 }
 0x11a   :  { %2187 = vmatpush.bf16.msk.msra.mxu0 %vm4872_vm7, %v4675_v3  ;;  %vm4962_vm7 = vnez %v4557_v36 }
 0x11b   :  { %2183 = vmatpush.bf16.msk.msrb.mxu3 %vm3944_vm5, %v4675_v3  ;;  %1634 = vmatmul.bf16.vlgmr.msrb.gmra.mxu2 %v1538_v47  ;;  %vm4968_vm5 = vnez %v4563_v60 }
 0x11c   :  { %2217 = vmatpush.bf16.msk.msra.mxu2 %vm4873_vm4, %v4675_v3  ;;  %vm4961_vm4 = vnez %v4553_v20  ;;  %v1382_v20 = vpack.c.bf16 %v1366_v2, %v1366_v2 }
 0x11d   :  { %2203 = vmatpush.bf16.msk.msra.mxu1 %vm4876_vm6, %v4675_v3  ;;  %vm4963_vm6 = vnez %v4559_v44  ;;  %v1383_v44 = vpack.c.bf16 %v1367_v27, %v1367_v27 }
 0x11e   :  { %2189 = vmatpush.bf16.msk.msra.mxu0 %vm4962_vm7, %v4675_v3  ;;  %1647 = vmatmul.bf16.vlgmr.msrb.gmra.mxu3 %v1539_v30  ;;  %vm4967_vm7 = vnez %v4567_v15 }
 0x11f   :  { %2233 = vmatpush.bf16.msk.msra.mxu3 %vm4960_vm0, %v4675_v3  ;;  %vm4965_vm0 = vnez %v4561_v52  ;;  %v4990_v52 = vld [vmem:[#allocation17_spill] sm:$0xff] }
 0x120   :  { %2219 = vmatpush.bf16.msk.msra.mxu2 %vm4961_vm4, %v4675_v3  ;;  %vm4966_vm4 = vnez %v4565_v6 }
 0x121   :  { %2205 = vmatpush.bf16.msk.msra.mxu1 %vm4963_vm6, %v4675_v3  ;;  %vm4969_vm6 = vnez %v4573_v41 }
 0x122   :  { %2191 = vmatpush.bf16.msk.msra.mxu0 %vm4966_vm4, %v4675_v3  ;;  %vm4972_vm4 = vnez %v4891_v29  ;;  %v1369_v29 = vld.sshfl [vmem:[#allocation1 + $0x28] sm:$0xff pattern:$0x73625140] }
 0x123   :  { %2235 = vmatpush.bf16.msk.msra.mxu3 %vm4964_vm15, %v4675_v3  ;;  %vm4970_vm15 = vnez %v4575_v51 }
 0x124   :  { %2221 = vmatpush.bf16.msk.msra.mxu2 %vm4965_vm0, %v4675_v3  ;;  %vm4971_vm0 = vnez %v4571_v32 }
 0x125   :  { %2207 = vmatpush.bf16.msk.msra.mxu1 %vm4967_vm7, %v4675_v3  ;;  %vm4975_vm7 = vnez %v4896_v4 }
 0x126   :  { %2193 = vmatpush.bf16.msk.msra.mxu0 %vm4969_vm6, %v4675_v3  ;;  %vm4976_vm6 = vnez %v4900_v43 }
 0x127   :  { %2237 = vmatpush.bf16.msk.msra.mxu3 %vm4968_vm5, %v4675_v3  ;;  %vm4973_vm5 = vnez %v4583_v18 }
 0x128   :  { %2223 = vmatpush.bf16.msk.msra.mxu2 %vm4887_vm10, %v4675_v3  ;;  %vm4974_vm10 = vnez %v4893_v49  ;;  %v1384_v49 = vpack.c.bf16 %v1368_v61, %v1368_v61 }
 0x129   :  { %2209 = vmatpush.bf16.msk.msra.mxu1 %vm4970_vm15, %v4675_v3  ;;  %vm4977_vm15 = vnez %v4898_v40  ;;  %v1425_v36 = vpop.f32.mrf.mxu0 }
 0x12a   :  { %2195 = vmatpush.bf16.msk.msra.mxu0 %vm4973_vm5, %v4675_v3  ;;  %vm4980_vm5 = vnez %v4909_v35 }
 0x12b   :  { %2239 = vmatpush.bf16.msk.msra.mxu3 %vm4971_vm0, %v4675_v3  ;;  %vm4978_vm0 = vnez %v4902_v22  ;;  %v1438_v60 = vpop.f32.mrf.mxu1  ;;  %v1451_v6 = vpop.f32.mrf.mxu2 }
 0x12c   :  { %2225 = vmatpush.bf16.msk.msra.mxu2 %vm4972_vm4, %v4675_v3  ;;  %vm4979_vm4 = vnez %v4904_v1  ;;  %v1439_v15 = vadd.f32 %v1438_v60, %v1425_v36  ;;  %v1464_v23 = vpop.f32.mrf.mxu3 }
 0x12d   :  { %2211 = vmatpush.bf16.msk.msra.mxu1 %vm4974_vm10, %v4675_v3  ;;  %vm4981_vm10 = vnez %v4906_v45 }
 0x12e   :  { %2197 = vmatpush.bf16.msk.msra.mxu0 %vm4977_vm15, %v4675_v3  ;;  %vm4984_vm15 = vnez %v4915_v56  ;;  %v1452_v32 = vadd.f32 %v1451_v6, %v1439_v15 }
 0x12f   :  { %2241 = vmatpush.bf16.msk.msra.mxu3 %vm4975_vm7, %v4675_v3  ;;  %vm4982_vm7 = vnez %v4913_v58 }
 0x130   :  { %2227 = vmatpush.bf16.msk.msra.mxu2 %vm4976_vm6, %v4675_v3  ;;  %vm4983_vm6 = vnez %v4911_v21  ;;  %v1465_v41 = vadd.f32 %v1464_v23, %v1452_v32  ;;  %v2315_v23 = vld [vmem:[%s4338_s1] ss:$0 sm:$0xff]  ;;  %s2346_s1 = smov [#allocation2]  }
 0x131   :  { %2213 = vmatpush.bf16.msk.msra.mxu1 %vm4978_vm0, %v4675_v3  ;;  %vm4985_vm0 = vnez %v4917_v50  ;;  %v1427_v51 = vpop.f32.mrf.mxu0  ;;  %2316 = vrcp.f32 %v2315_v23  ;;  %s1789_s14 = sshll.u32 %s2346_s1, 4  ;;  %s1790_s14 = int_to_ptr.vmem [resolvable:$true] %s1789_s14 }
 0x132   :  { %2199 = vmatpush.bf16.msk.msra.mxu0 %vm4981_vm10, %v4675_v3  ;;  %vm4988_vm10 = vnez %v4923_v14 }
 0x133   :  { %2243 = vmatpush.bf16.msk.msra.mxu3 %vm4979_vm4, %v4675_v3  ;;  %vm4986_vm4 = vnez %v4919_v0  ;;  %v1440_v18 = vpop.f32.mrf.mxu1  ;;  %v1453_v19 = vpop.f32.mrf.mxu2 }
 0x134   :  { %2229 = vmatpush.bf16.msk.msra.mxu2 %vm4980_vm5, %v4675_v3  ;;  %vm4987_vm5 = vnez %v4921_v12  ;;  %v1466_v28 = vpop.f32.mrf.mxu3 }
 0x135   :  { %2215 = vmatpush.bf16.msk.msra.mxu1 %vm4982_vm7, %v4675_v3  ;;  %1660 = vmatmul.bf16.vlgmr.msra.gmra.mxu0 %v1380_v57  ;;  %vm4989_vm7 = vnez %v4925_v25 }
 0x136   :  { %2249 = vmatpush.bf16.msk.msrb.mxu0 %vm4983_vm6, %v4675_v3  ;;  %vm4991_vm6 = vnez %v4990_v52 }
 0x137   :  { %2245 = vmatpush.bf16.msk.msra.mxu3 %vm4985_vm0, %v4675_v3  ;;  %vm4993_vm0 = vnez %v4931_v62  ;;  %v2317_v19 = vpop.eup %2316 }
 0x138   :  { %2231 = vmatpush.bf16.msk.msra.mxu2 %vm4986_vm4, %v4675_v3  ;;  %1673 = vmatmul.bf16.vlgmr.msra.gmra.mxu1 %v1381_v11  ;;  %vm4994_vm4 = vnez %v4933_v16 }
 0x139   :  { %2265 = vmatpush.bf16.msk.msrb.mxu1 %vm4984_vm15, %v4675_v3  ;;  %vm4992_vm15 = vnez %v4929_v31 }
 0x13a   :  { %2251 = vmatpush.bf16.msk.msrb.mxu0 %vm4988_vm10, %v4675_v3  ;;  %vm4996_vm10 = vnez %v4753_v33  ;;  %v5002_v33 = vld [vmem:[#allocation32_spill] sm:$0xff] }
 0x13b   :  { %2247 = vmatpush.bf16.msk.msra.mxu3 %vm4991_vm6, %v4675_v3  ;;  %1686 = vmatmul.bf16.vlgmr.msra.gmra.mxu2 %v1382_v20  ;;  %vm5000_vm6 = vnez %v4791_v37 }
 0x13c   :  { %2281 = vmatpush.bf16.msk.msrb.mxu2 %vm4987_vm5, %v4675_v3  ;;  %vm4995_vm5 = vnez %v4740_v38 }
 0x13d   :  { %2267 = vmatpush.bf16.msk.msrb.mxu1 %vm4989_vm7, %v4675_v3  ;;  %vm4997_vm7 = vnez %v4766_v26  ;;  %v5006_v26 = vld [vmem:[#allocation36_spill] sm:$0xff] }
 0x13e   :  { %2253 = vmatpush.bf16.msk.msrb.mxu0 %vm4994_vm4, %v4675_v3  ;;  %1699 = vmatmul.bf16.vlgmr.msra.gmra.mxu3 %v1383_v44  ;;  %vm5007_vm4 = vnez %v5006_v26  ;;  %v2345_v44 = vmov 0.0  }
 0x13f   :  { %2297 = vmatpush.bf16.msk.msrb.mxu3 %vm4992_vm15, %v4675_v3  ;;  %vm5003_vm15 = vnez %v5002_v33  ;;  %16 = vst [vmem:[#allocation2] sm:$0x3] %v2345_v44  ;;  %v1769_v33 = vmul.f32 %v2317_v19, %v2315_v23 }
 0x140   :  { %2283 = vmatpush.bf16.msk.msrb.mxu2 %vm4993_vm0, %v4675_v3 }
 0x141   :  { %2269 = vmatpush.bf16.msk.msrb.mxu1 %vm4936_vm13, %v4675_v3  ;;  %vm4998_vm13 = vnez %v4745_v9  ;;  %v5004_v9 = vld [vmem:[#allocation34_spill] sm:$0xff] }
 0x142   :  { %2255 = vmatpush.bf16.msk.msrb.mxu0 %vm4996_vm10, %v4675_v3  ;;  %vm5005_vm0 = vnez %v5004_v9  ;;  %vm5012_vm10 = vnez %v4852_v17  ;;  %v1370_v17 = vld.sshfl [vmem:[#allocation1 + $0x30] sm:$0xff pattern:$0x73625140] }
 0x143   :  { %2299 = vmatpush.bf16.msk.msrb.mxu3 %vm4938_vm14, %v4675_v3  ;;  %vm4999_vm14 = vnez %v4776_v7  ;;  %v5008_v7 = vld [vmem:[#allocation37_spill] sm:$0xff]  ;;  %v1386_v54 = vpack.c.bf16 %v1370_v17, %v1370_v17 }
 0x144   :  { %2285 = vmatpush.bf16.msk.msrb.mxu2 %vm4995_vm5, %v4675_v3  ;;  %vm5009_vm5 = vnez %v5008_v7 }
 0x145   :  { %2271 = vmatpush.bf16.msk.msrb.mxu1 %vm4997_vm7, %v4675_v3  ;;  %vm5013_vm7 = vnez %v4860_v59  ;;  %v1371_v59 = vld.sshfl [vmem:[#allocation1 + $0x38] sm:$0xff pattern:$0x73625140] }
 0x146   :  { %2257 = vmatpush.bf16.msk.msrb.mxu0 %vm5000_vm6, %v4675_v3 }
 0x147   :  { %2301 = vmatpush.bf16.msk.msrb.mxu3 %vm4998_vm13, %v4675_v3 }
 0x148   :  { %2287 = vmatpush.bf16.msk.msrb.mxu2 %vm4999_vm14, %v4675_v3 }
 0x149   :  { %2273 = vmatpush.bf16.msk.msrb.mxu1 %vm4942_vm1, %v4675_v3  ;;  %vm5011_vm1 = vnez %v4949_v24  ;;  %v1385_v24 = vpack.c.bf16 %v1369_v29, %v1369_v29  ;;  %v1770_v29 = vsub.f32 1.0, %v1769_v33 }
 0x14a   :  { %2259 = vmatpush.bf16.msk.msrb.mxu0 %vm5007_vm4, %v4675_v3 }
 0x14b   :  { %2303 = vmatpush.bf16.msk.msrb.mxu3 %vm5003_vm15, %v4675_v3 }
 0x14c   :  { %2289 = vmatpush.bf16.msk.msrb.mxu2 %vm5005_vm0, %v4675_v3 }
 0x14d   :  { %2275 = vmatpush.bf16.msk.msrb.mxu1 %vm5009_vm5, %v4675_v3 }
 0x14e   :  { %2261 = vmatpush.bf16.msk.msrb.mxu0 %vm5012_vm10, %v4675_v3 }
 0x14f   :  { %2305 = vmatpush.bf16.msk.msrb.mxu3 %vm4947_vm9, %v4675_v3  ;;  %vm5014_vm9 = vnez %v4862_v55  ;;  %v1387_v55 = vpack.c.bf16 %v1371_v59, %v1371_v59  ;;  %v1771_v59 = vmul.f32 %v2317_v19, %v1770_v29 }
 0x150   :  { %2291 = vmatpush.bf16.msk.msrb.mxu2 %vm5011_vm1, %v4675_v3 }
 0x151   :  { %2277 = vmatpush.bf16.msk.msrb.mxu1 %vm5013_vm7, %v4675_v3 }
 0x152   :  { %2263 = vmatpush.bf16.msk.msrb.mxu0 %vm4957_vm8, %v4675_v3  ;;  %v1477_v46 = vpop.f32.mrf.mxu0 }
 0x153   :  { %2307 = vmatpush.bf16.msk.msrb.mxu3 %vm4954_vm12, %v4675_v3  ;;  %vm5015_vm12 = vnez %v4875_v5  ;;  %v1478_v34 = vadd.f32 %v1477_v46, %v1465_v41 }
 0x154   :  { %2293 = vmatpush.bf16.msk.msrb.mxu2 %vm5014_vm9, %v4675_v3 }
 0x155   :  { %2279 = vmatpush.bf16.msk.msrb.mxu1 %vm3916_vm3, %v4675_v3  ;;  %1712 = vmatmul.bf16.vlgmr.msrb.gmra.mxu0 %v1384_v49  ;;  %v1490_v4 = vpop.f32.mrf.mxu1  ;;  %vm1773_vm3 = vweird.f32 %v2315_v23 }
 0x156   :  { %v1491_v63 = vadd.f32 %v1490_v4, %v1478_v34  ;;  %v1779_v34 = vand.u32 2147483648, %v2315_v23 }
 0x157   :  { %2309 = vmatpush.bf16.msk.msrb.mxu3 %vm4959_vm11, %v4675_v3 }
 0x158   :  { %2295 = vmatpush.bf16.msk.msrb.mxu2 %vm3931_vm2, %v4675_v3  ;;  %1725 = vmatmul.bf16.vlgmr.msrb.gmra.mxu1 %v1385_v24  ;;  %vm1774_vm2 = vweird.f32 %v2317_v19 }
 0x159   :  { %vm1775_vm11 = vmor %vm1773_vm3, %vm1774_vm2 }
 0x15a   :  { %v1479_v40 = vpop.f32.mrf.mxu0 }
 0x15b   :  { %2311 = vmatpush.bf16.msk.msrb.mxu3 %vm5015_vm12, %v4675_v3  ;;  %1738 = vmatmul.bf16.vlgmr.msrb.gmra.mxu2 %v1386_v54  ;;  %v1772_v40 = vadd.f32 %v2317_v19, %v1771_v59 }
 0x15d   :  { %v1492_v43 = vpop.f32.mrf.mxu1 }
 0x15e   :  { %1751 = vmatmul.bf16.vlgmr.msrb.gmra.mxu3 %v1387_v55  ;;  %v1503_v22 = vpop.f32.mrf.mxu2  ;;  %v1757_v55 = vld [vmem:[#allocation2] sm:$0x3]  ;;  %v1777_v43 = vand.u32 2147483647, %v2315_v23 }
 0x15f   :  { %v1504_v1 = vadd.f32 %v1503_v22, %v1491_v63 }
 0x160   :  { %vm1778_vm8 = vcmp.eq.f32.partialorder %v1777_v43, 8.507059e+37 }
 0x161   :  { %v1516_v45 = vpop.f32.mrf.mxu3 }
 0x162   :  { %v1517_v35 = vadd.f32 %v1516_v45, %v1504_v1  ;;  %v1780_v1 = vor.u32 1.1754944e-38, %v1779_v34  ;;  %v1776_v45 = vsel %vm1775_vm11, %v2317_v19, %v1772_v40 }
 0x166   :  { %v1505_v13 = vpop.f32.mrf.mxu2 }
 0x169   :  { %v1518_v21 = vpop.f32.mrf.mxu3 }
 0x172   :  { %v1557_v58 = vpop.f32.mrf.mxu0 }
 0x173   :  { %v1558_v56 = vadd.f32 %v1557_v58, %v1517_v35  ;;  %v1781_v35 = vsel %vm1778_vm8, %v1780_v1, %v1776_v45 }
 0x175   :  { %v1570_v50 = vpop.f32.mrf.mxu1 }
 0x176   :  { %v1571_v0 = vadd.f32 %v1570_v50, %v1558_v56 }
 0x17a   :  { %v1559_v5 = vpop.f32.mrf.mxu0 }
 0x17d   :  { %v1572_v3 = vpop.f32.mrf.mxu1 }
 0x17e   :  { %v1583_v12 = vpop.f32.mrf.mxu2 }
 0x17f   :  { %v1584_v14 = vadd.f32 %v1583_v12, %v1571_v0 }
 0x181   :  { %v1596_v25 = vpop.f32.mrf.mxu3 }
 0x182   :  { %v1597_v8 = vadd.f32 %v1596_v25, %v1584_v14 }
 0x186   :  { %v1585_v31 = vpop.f32.mrf.mxu2 }
 0x189   :  { %v1598_v62 = vpop.f32.mrf.mxu3 }
 0x192   :  { %v1609_v16 = vpop.f32.mrf.mxu0 }
 0x193   :  { %v1610_v39 = vadd.f32 %v1609_v16, %v1597_v8 }
 0x195   :  { %v1622_v10 = vpop.f32.mrf.mxu1 }
 0x196   :  { %v1623_v53 = vadd.f32 %v1622_v10, %v1610_v39 }
 0x19a   :  { %v1611_v47 = vpop.f32.mrf.mxu0 }
 0x19d   :  { %v1624_v30 = vpop.f32.mrf.mxu1 }
 0x19e   :  { %v1635_v42 = vpop.f32.mrf.mxu2 }
 0x19f   :  { %v1636_v37 = vadd.f32 %v1635_v42, %v1623_v53 }
 0x1a1   :  { %v1648_v48 = vpop.f32.mrf.mxu3 }
 0x1a2   :  { %v1649_v17 = vadd.f32 %v1648_v48, %v1636_v37 }
 0x1a6   :  { %v1637_v57 = vpop.f32.mrf.mxu2 }
 0x1a9   :  { %v1650_v2 = vpop.f32.mrf.mxu3 }
 0x1b2   :  { %v1661_v11 = vpop.f32.mrf.mxu0 }
 0x1b5   :  { %v1674_v20 = vpop.f32.mrf.mxu1 }
 0x1b6   :  { %v1675_v32 = vadd.f32 %v1674_v20, %v1661_v11 }
 0x1ba   :  { %v1663_v27 = vpop.f32.mrf.mxu0 }
 0x1bd   :  { %v1676_v36 = vpop.f32.mrf.mxu1 }
 0x1be   :  { %v1687_v52 = vpop.f32.mrf.mxu2 }
 0x1bf   :  { %v1688_v41 = vadd.f32 %v1687_v52, %v1675_v32 }
 0x1c1   :  { %v1700_v60 = vpop.f32.mrf.mxu3 }
 0x1c2   :  { %v1701_v28 = vadd.f32 %v1700_v60, %v1688_v41 }
 0x1c6   :  { %v1689_v6 = vpop.f32.mrf.mxu2 }
 0x1c9   :  { %v1702_v15 = vpop.f32.mrf.mxu3 }
 0x1d2   :  { %v1713_v51 = vpop.f32.mrf.mxu0 }
 0x1d3   :  { %v1714_v38 = vadd.f32 %v1713_v51, %v1701_v28 }
 0x1d5   :  { %v1726_v18 = vpop.f32.mrf.mxu1 }
 0x1d6   :  { %v1727_v26 = vadd.f32 %v1726_v18, %v1714_v38 }
 0x1da   :  { %v1715_v9 = vpop.f32.mrf.mxu0 }
 0x1dd   :  { %v1728_v7 = vpop.f32.mrf.mxu1 }
 0x1de   :  { %v1739_v61 = vpop.f32.mrf.mxu2 }
 0x1df   :  { %v1740_v49 = vadd.f32 %v1739_v61, %v1727_v26 }
 0x1e1   :  { %v1752_v24 = vpop.f32.mrf.mxu3 }
 0x1e2   :  { %v1753_v54 = vadd.f32 %v1752_v24, %v1740_v49 }
 0x1e4   :  { %v1756_v46 = vadd.f32 %v1753_v54, %v1649_v17 }
 0x1e6   :  { %v1758_v4 = vadd.f32 %v1757_v55, %v1756_v46  ;;  %v1741_v63 = vpop.f32.mrf.mxu2 }
 0x1e8   :  { %1759 = vst [vmem:[#allocation2] sm:$0x3] %v1758_v4 }
 0x1e9   :  { %v1754_v22 = vpop.f32.mrf.mxu3 }
 0x1ef   :  { %v1763_v13 = vld [vmem:[#allocation2] sm:$0x3] }
 0x1f0   :  { %v1782_v21 = vmul.f32 %v1781_v35, %v1763_v13 }
 0x1f2   :  { %1783 = vst [vmem:[#allocation2] sm:$0x3] %v1782_v21 }
 0x1f3   :  { %1794 = dma.vmem_to_hbm [thread:$0]  %s1790_s14, 32, %s1792_s17, [#allocation3]  }
 0x1f4   :  { %2342 = dma.done.wait [#allocation3], 32  }
 0x1f5   :  { %2343 = vsyncadd [#allocation3], 4294967264 }
 0x1f6   :  { %1799 = vsyncpa [#allocation3], 1 }

</bundles_post_ra>
